<compile_context>
chip_gen: v7x
topology: tpu7x:2x2x1
jax: 0.10.0
libtpu: 0.0.40
codegen_flags: <defaults>
</compile_context>

<pallas_src>
import jax
import jax.numpy as jnp
from jax import lax
from jax.experimental import pallas as pl
from jax.experimental.pallas import tpu as pltpu

BN_EPS = 1e-5
INV_SQRT2 = 0.7071067811865476


def _erf_approx(x):
    # float32-accurate rational approximation (Abramowitz & Stegun 7.1.26).
    a1, a2, a3, a4, a5 = (0.254829592, -0.284496736, 1.421413741,
                          -1.453152027, 1.061405429)
    p = 0.3275911
    s = jnp.where(x < 0.0, -1.0, 1.0)
    z = jnp.abs(x)
    # divide -> EUP (off the VALU path); error far inside the test tolerance.
    t = pl.reciprocal(1.0 + p * z, approx=True)
    poly = ((((a5 * t + a4) * t + a3) * t + a2) * t + a1) * t
    return s * (1.0 - poly * jnp.exp(-z * z))


def _gelu(x):
    # nn.GELU() default is the exact (erf-based) GELU.
    return 0.5 * x * (1.0 + _erf_approx(x * INV_SQRT2))


# ------------------------------ Pallas kernel --------------------------------

def _make_fused_kernel(n_batch, cout, hout, wout, wp, mp, num_layers,
                       up_shifts, tap_shifts, inv_count):
    rows = n_batch * cout

    def kernel(hin_ref, wup_ref, wc_ref, p_ref, o_ref):
        # ---- valid-pixel mask, in-kernel from a lane iota -------------------
        # Exact float decode of (row, col) from the flat padded index:
        # floor((2q+1)/(2*Wp)) == q // Wp for the integer magnitudes here.
        qf = lax.broadcasted_iota(jnp.int32, (1, mp), 1).astype(jnp.float32)
        yp = jnp.floor((qf * 2.0 + 1.0) * (0.5 / wp))
        xp = qf - yp * wp
        valid = ((yp >= 1.0) & (yp <= float(hout))
                 & (xp >= 1.0) & (xp <= float(wout)))
        mask = jnp.broadcast_to(valid.astype(jnp.float32), (rows, mp))

        par = p_ref[...]                                    # (rows, 1 + 3L)

        # ---- ConvTranspose2d(k=2, s=2): one stacked-phase GEMM --------------
        # hin holds the concatenated input channels pre-placed at the phase
        # (0,0) positions of the padded full-res flat layout; rolling by
        # {0, 1, Wp, Wp+1} realizes the other three sub-pixel phases.
        hin = hin_ref[...]                                  # (N*Cin, MP)
        xu = jnp.concatenate(
            [hin if s == 0 else pltpu.roll(hin, s, axis=1)
             for s in up_shifts], axis=0)                   # (4*N*Cin, MP)
        h = jnp.dot(wup_ref[...], xu, preferred_element_type=jnp.float32)
        h = (h + par[:, 0:1]) * mask                        # (rows, MP)

        # ---- 4 x [Conv3x3 -> BatchNorm(batch stats) -> GELU], on-chip -------
        for l in range(num_layers):
            # im2col via 9 lane rolls stacked on the contraction axis; wrapped
            # values only ever land at masked halo/tail positions.
            x = jnp.concatenate(
                [h if s == 0 else pltpu.roll(h, s, axis=1)
                 for s in tap_shifts], axis=0)              # (9*rows, MP)
            acc = jnp.dot(wc_ref[l], x, preferred_element_type=jnp.float32)
            acc = acc + par[:, 3 * l + 1:3 * l + 2]         # conv bias

            # Masked single-pass stats per (n, c) row, then combine the
            # per-image partials per channel with sublane roll-adds (every
            # row ends up holding its channel's total).
            am = acc * mask
            s1 = jnp.sum(am, axis=1, keepdims=True)         # (rows, 1)
            s2 = jnp.sum(am * acc, axis=1, keepdims=True)
            t1, t2 = s1, s2
            for k in range(1, n_batch):
                t1 = t1 + pltpu.roll(s1, k * cout, axis=0)
                t2 = t2 + pltpu.roll(s2, k * cout, axis=0)

            mean = t1 * inv_count
            var = t2 * inv_count - mean * mean
            scale = par[:, 3 * l + 2:3 * l + 3] * lax.rsqrt(var + BN_EPS)
            shift = par[:, 3 * l + 3:3 * l + 4] - mean * scale
            # mask re-zeroes halo / tail so it acts as zero padding for the
            # next conv layer.
            h = _gelu(acc * scale + shift) * mask

        o_ref[...] = h                                      # lane-dense store

    return kernel


# -------------------------------- wrapper -------------------------------------

def _full_spec(shape):
    return pl.BlockSpec(shape, lambda i: (0,) * len(shape))


_LAYERS = (('rb1', 'c1'), ('rb1', 'c2'), ('rb2', 'c1'), ('rb2', 'c2'))


def unet_up_forward(x_nchw, skip_nchw, params):
    n_batch, cx, hin_sp, win_sp = x_nchw.shape
    cin = cx + skip_nchw.shape[1]
    cout = params['up_w'].shape[-1]
    hout, wout = 2 * hin_sp, 2 * win_sp
    hp, wp = hout + 2, wout + 2                    # +1 halo ring each side
    mval = hp * wp                                 # flat padded spatial length
    mp = ((mval + 127) // 128) * 128               # lane-aligned buffer length
    rows = n_batch * cout
    num_layers = len(_LAYERS)

    # ---- torch.cat((x, skip), 1), channel-major, dilate-by-2 into the padded
    # full-res flat layout (phase (0,0) slots).  Single interior-pad op.
    h_cat = jnp.concatenate([x_nchw, skip_nchw], axis=1)      # (N, Cin, H, W)
    h3 = h_cat.reshape(n_batch * cin, hin_sp, win_sp).astype(jnp.float32)
    placed = lax.pad(h3, jnp.zeros((), h3.dtype),
                     ((0, 0, 0), (1, 2, 1), (1, 2, 1)))       # (N*Cin, Hp, Wp)
    placed = placed.reshape(n_batch * cin, mval)
    placed = jnp.pad(placed, ((0, 0), (0, mp - mval)))        # (N*Cin, MP)

    eye = jnp.eye(n_batch, dtype=jnp.float32)

    # ConvTranspose weight -> (rows, 4*N*Cin) block-diag stacked-phase matrix.
    w_up = params['up_w']                                     # (Cin, 2, 2, Co)
    phases = ((0, 0), (0, 1), (1, 0), (1, 1))
    up_shifts = tuple(wp * di + dj for di, dj in phases)
    blocks = jnp.stack([w_up[:, di, dj, :].T for di, dj in phases])  # (4,Co,Ci)
    wup = jnp.einsum('nm,sok->nosmk', eye, blocks).reshape(rows, 4 * n_batch * cin)

    # Conv3x3 weights -> per-layer (rows, 9*rows) block-diag stacked-tap matrix.
    offsets = tuple((kh - 1) * wp + (kw - 1)
                    for kh in range(3) for kw in range(3))
    tap_shifts = tuple((-off) % mp for off in offsets)
    wc = []
    for b, c in _LAYERS:
        kt = params[f'{b}_{c}_w'].transpose(0, 1, 3, 2).reshape(9, cout, cout)
        wc.append(jnp.einsum('nm,tok->notmk', eye, kt).reshape(rows, 9 * rows))
    wc = jnp.stack(wc)                                        # (L, rows, 9*rows)

    # bias / gamma / beta packed lane-dense into one (rows, 1+3L) tile.
    cols = [jnp.tile(params['up_b'], n_batch)]
    for b, c in _LAYERS:
        for k in ('b', 'g', 'be'):
            cols.append(jnp.tile(params[f'{b}_{c}_{k}'], n_batch))
    par = jnp.stack(cols, axis=1).astype(jnp.float32)         # (rows, 13)

    inv_count = 1.0 / float(n_batch * hout * wout)
    kernel = _make_fused_kernel(n_batch, cout, hout, wout, wp, mp, num_layers,
                                up_shifts, tap_shifts, inv_count)

    hflat = pl.pallas_call(
        kernel,
        out_shape=jax.ShapeDtypeStruct((rows, mp), jnp.float32),
        grid=(1,),
        in_specs=[_full_spec((n_batch * cin, mp)),
                  _full_spec((rows, 4 * n_batch * cin)),
                  _full_spec((num_layers, rows, 9 * rows)),
                  _full_spec((rows, 1 + 3 * num_layers))],
        out_specs=_full_spec((rows, mp)),
        compiler_params=pltpu.CompilerParams(
            dimension_semantics=("arbitrary",)),
    )(placed, wup, wc, par)

    # Crop halo / tail; rows are already (n, c) n-major -> NCHW directly.
    out = hflat[:, :mval].reshape(n_batch, cout, hp, wp)
    return out[:, :, 1:1 + hout, 1:1 + wout]
# TODO(synk): BatchNorm running_mean/running_var updates (training-mode side
# effect) are not modeled; only the forward output is reproduced.


# ------------------------- pure-JAX reference (check) -------------------------

def unet_up_reference(x_nchw, skip_nchw, params):
    x = jnp.transpose(x_nchw, (0, 2, 3, 1))
    skip = jnp.transpose(skip_nchw, (0, 2, 3, 1))
    h = jnp.concatenate([x, skip], axis=-1)
    n, hh, ww, _ = h.shape
    w, b = params['up_w'], params['up_b']
    cout = w.shape[-1]
    t = jnp.einsum('nijc,cpqo->nipjqo', h, w)
    h = t.reshape(n, 2 * hh, 2 * ww, cout) + b
    for blk in ('rb1', 'rb2'):
        for cv in ('c1', 'c2'):
            wk = params[f'{blk}_{cv}_w']
            h = lax.conv_general_dilated(
                h, wk, window_strides=(1, 1), padding=((1, 1), (1, 1)),
                dimension_numbers=('NHWC', 'HWIO', 'NHWC'),
                precision=lax.Precision.HIGHEST) + params[f'{blk}_{cv}_b']
            mean = jnp.mean(h, axis=(0, 1, 2), keepdims=True)
            var = jnp.mean((h - mean) ** 2, axis=(0, 1, 2), keepdims=True)
            h = (h - mean) * lax.rsqrt(var + BN_EPS)
            h = h * params[f'{blk}_{cv}_g'] + params[f'{blk}_{cv}_be']
            h = jax.nn.gelu(h, approximate=False)
    return jnp.transpose(h, (0, 3, 1, 2))


# ----------------------------------- main --------------------------------------

def init_params(key, in_channels, out_channels):
    ks = jax.random.split(key, 8)
    p = {
        'up_w': 0.2 * jax.random.normal(
            ks[0], (in_channels, 2, 2, out_channels), jnp.float32),
        'up_b': 0.1 * jax.random.normal(ks[1], (out_channels,), jnp.float32),
    }
    i = 2
    for blk in ('rb1', 'rb2'):
        for cv in ('c1', 'c2'):
            p[f'{blk}_{cv}_w'] = 0.2 * jax.random.normal(
                ks[i], (3, 3, out_channels, out_channels), jnp.float32)
            p[f'{blk}_{cv}_b'] = 0.1 * jax.random.normal(
                jax.random.fold_in(ks[i], 1), (out_channels,), jnp.float32)
            # BatchNorm2d affine params (PyTorch default init: weight=1, bias=0)
            p[f'{blk}_{cv}_g'] = jnp.ones((out_channels,), jnp.float32)
            p[f'{blk}_{cv}_be'] = jnp.zeros((out_channels,), jnp.float32)
            i += 1
    return p


if __name__ == "__main__":
    in_channels, out_channels = 8, 4          # cat(x, skip) -> 8 channels
    N, Hs, Ws = 2, 8, 8                       # spatial doubles to 16x16
    key = jax.random.PRNGKey(0)
    kx, ksk, kp = jax.random.split(key, 3)
    x = jax.random.normal(kx, (N, in_channels // 2, Hs, Ws), jnp.float32)      # NCHW
    skip = jax.random.normal(ksk, (N, in_channels // 2, Hs, Ws), jnp.float32)  # NCHW
    params = init_params(kp, in_channels, out_channels)

    fwd = jax.jit(unet_up_forward)
    out = jax.block_until_ready(fwd(x, skip, params))
    ref = jax.block_until_ready(unet_up_reference(x, skip, params))

    assert out.shape == (N, out_channels, 2 * Hs, 2 * Ws), out.shape
    max_diff = float(jnp.max(jnp.abs(out - ref)))
    assert max_diff < 5e-2, f"mismatch vs reference, max abs diff = {max_diff}"
    print("KERNEL_OK")
</pallas_src>

<mosaic_0001>
module attributes {stable_mosaic.version = 11 : i64} {
  func.func @kernel(%arg0: i32, %arg1: memref<16x384xf32, #tpu.memory_space<vmem>>, %arg2: memref<8x64xf32, #tpu.memory_space<vmem>>, %arg3: memref<4x8x72xf32, #tpu.memory_space<vmem>>, %arg4: memref<8x13xf32, #tpu.memory_space<vmem>>, %arg5: memref<8x384xf32, #tpu.memory_space<vmem>>) attributes {dimension_semantics = [#tpu.dimension_semantics<arbitrary>], iteration_bounds = array<i64: 1>, scalar_prefetch = 0 : i64, scratch_operands = 0 : i64, tpu.core_type = #tpu.core_type<tc>, window_params = [{pipeline_mode = #tpu.pipeline_mode<synchronous>, transform_indices = @transform_0, window_bounds = array<i64: 16, 384>}, {pipeline_mode = #tpu.pipeline_mode<synchronous>, transform_indices = @transform_1, window_bounds = array<i64: 8, 64>}, {pipeline_mode = #tpu.pipeline_mode<synchronous>, transform_indices = @transform_2, window_bounds = array<i64: 4, 8, 72>}, {pipeline_mode = #tpu.pipeline_mode<synchronous>, transform_indices = @transform_3, window_bounds = array<i64: 8, 13>}, {pipeline_mode = #tpu.pipeline_mode<synchronous>, transform_indices = @transform_4, window_bounds = array<i64: 8, 384>}]} {
    %0 = tpu.iota {dimensions = array<i32: 1>} : vector<1x384xi32>
    %1 = arith.sitofp %0 : vector<1x384xi32> to vector<1x384xf32>
    %cst = arith.constant 2.000000e+00 : f32
    %2 = vector.broadcast %cst : f32 to vector<1x384xf32>
    %3 = arith.mulf %1, %2 : vector<1x384xf32>
    %cst_0 = arith.constant 1.000000e+00 : f32
    %4 = vector.broadcast %cst_0 : f32 to vector<1x384xf32>
    %5 = arith.addf %3, %4 : vector<1x384xf32>
    %cst_1 = arith.constant 0.027777778 : f32
    %6 = vector.broadcast %cst_1 : f32 to vector<1x384xf32>
    %7 = arith.mulf %5, %6 : vector<1x384xf32>
    %8 = math.floor %7 : vector<1x384xf32>
    %cst_2 = arith.constant 1.800000e+01 : f32
    %9 = vector.broadcast %cst_2 : f32 to vector<1x384xf32>
    %10 = arith.mulf %8, %9 : vector<1x384xf32>
    %11 = arith.subf %1, %10 : vector<1x384xf32>
    %cst_3 = arith.constant 1.000000e+00 : f32
    %12 = vector.broadcast %cst_3 : f32 to vector<1x384xf32>
    %13 = arith.cmpf oge, %8, %12 : vector<1x384xf32>
    %cst_4 = arith.constant 1.600000e+01 : f32
    %14 = vector.broadcast %cst_4 : f32 to vector<1x384xf32>
    %15 = arith.cmpf ole, %8, %14 : vector<1x384xf32>
    %16 = arith.andi %13, %15 : vector<1x384xi1>
    %cst_5 = arith.constant 1.000000e+00 : f32
    %17 = vector.broadcast %cst_5 : f32 to vector<1x384xf32>
    %18 = arith.cmpf oge, %11, %17 : vector<1x384xf32>
    %19 = arith.andi %16, %18 : vector<1x384xi1>
    %cst_6 = arith.constant 1.600000e+01 : f32
    %20 = vector.broadcast %cst_6 : f32 to vector<1x384xf32>
    %21 = arith.cmpf ole, %11, %20 : vector<1x384xf32>
    %22 = arith.andi %19, %21 : vector<1x384xi1>
    %23 = arith.extui %22 : vector<1x384xi1> to vector<1x384xi32>
    %24 = arith.sitofp %23 : vector<1x384xi32> to vector<1x384xf32>
    %25 = vector.shape_cast %24 : vector<1x384xf32> to vector<1x384xf32>
    %26 = vector.broadcast %25 : vector<1x384xf32> to vector<8x384xf32>
    %c0 = arith.constant 0 : index
    %c0_7 = arith.constant 0 : index
    %27 = vector.load %arg4[%c0, %c0_7] : memref<8x13xf32, #tpu.memory_space<vmem>>, vector<8x13xf32>
    %c0_8 = arith.constant 0 : index
    %c0_9 = arith.constant 0 : index
    %28 = vector.load %arg1[%c0_8, %c0_9] : memref<16x384xf32, #tpu.memory_space<vmem>>, vector<16x384xf32>
    %c1_i32 = arith.constant 1 : i32
    %29 = tpu.dynamic_rotate %28 by %c1_i32 dim 1 : vector<16x384xf32>, i32 -> vector<16x384xf32>
    %c18_i32 = arith.constant 18 : i32
    %30 = tpu.dynamic_rotate %28 by %c18_i32 dim 1 : vector<16x384xf32>, i32 -> vector<16x384xf32>
    %c19_i32 = arith.constant 19 : i32
    %31 = tpu.dynamic_rotate %28 by %c19_i32 dim 1 : vector<16x384xf32>, i32 -> vector<16x384xf32>
    %32 = tpu.concatenate %28, %29, %30, %31 in 0 : vector<16x384xf32>, vector<16x384xf32>, vector<16x384xf32>, vector<16x384xf32> -> vector<64x384xf32>
    %c0_10 = arith.constant 0 : index
    %c0_11 = arith.constant 0 : index
    %33 = vector.load %arg2[%c0_10, %c0_11] : memref<8x64xf32, #tpu.memory_space<vmem>>, vector<8x64xf32>
    %cst_12 = arith.constant dense<0.000000e+00> : vector<8x384xf32>
    %34 = tpu.matmul %33, %32, %cst_12 {dimension_numbers = #tpu.dot_dimension_numbers<[1], [0], [0], [1], [0, 0, 1, 1], [], []>} : vector<8x64xf32>, vector<64x384xf32>, vector<8x384xf32> -> vector<8x384xf32>
    %35 = vector.extract_strided_slice %27 {offsets = [0, 0], sizes = [8, 1], strides = [1, 1]} : vector<8x13xf32> to vector<8x1xf32>
    %36 = vector.broadcast %35 : vector<8x1xf32> to vector<8x384xf32>
    %37 = arith.addf %34, %36 : vector<8x384xf32>
    %38 = arith.mulf %37, %26 : vector<8x384xf32>
    %c19_i32_13 = arith.constant 19 : i32
    %39 = tpu.dynamic_rotate %38 by %c19_i32_13 dim 1 : vector<8x384xf32>, i32 -> vector<8x384xf32>
    %c18_i32_14 = arith.constant 18 : i32
    %40 = tpu.dynamic_rotate %38 by %c18_i32_14 dim 1 : vector<8x384xf32>, i32 -> vector<8x384xf32>
    %c17_i32 = arith.constant 17 : i32
    %41 = tpu.dynamic_rotate %38 by %c17_i32 dim 1 : vector<8x384xf32>, i32 -> vector<8x384xf32>
    %c1_i32_15 = arith.constant 1 : i32
    %42 = tpu.dynamic_rotate %38 by %c1_i32_15 dim 1 : vector<8x384xf32>, i32 -> vector<8x384xf32>
    %c383_i32 = arith.constant 383 : i32
    %43 = tpu.dynamic_rotate %38 by %c383_i32 dim 1 : vector<8x384xf32>, i32 -> vector<8x384xf32>
    %c367_i32 = arith.constant 367 : i32
    %44 = tpu.dynamic_rotate %38 by %c367_i32 dim 1 : vector<8x384xf32>, i32 -> vector<8x384xf32>
    %c366_i32 = arith.constant 366 : i32
    %45 = tpu.dynamic_rotate %38 by %c366_i32 dim 1 : vector<8x384xf32>, i32 -> vector<8x384xf32>
    %c365_i32 = arith.constant 365 : i32
    %46 = tpu.dynamic_rotate %38 by %c365_i32 dim 1 : vector<8x384xf32>, i32 -> vector<8x384xf32>
    %47 = tpu.concatenate %39, %40, %41, %42, %38, %43, %44, %45, %46 in 0 : vector<8x384xf32>, vector<8x384xf32>, vector<8x384xf32>, vector<8x384xf32>, vector<8x384xf32>, vector<8x384xf32>, vector<8x384xf32>, vector<8x384xf32>, vector<8x384xf32> -> vector<72x384xf32>
    %c0_16 = arith.constant 0 : index
    %c0_17 = arith.constant 0 : index
    %c0_18 = arith.constant 0 : index
    %48 = vector.load %arg3[%c0_16, %c0_17, %c0_18] : memref<4x8x72xf32, #tpu.memory_space<vmem>>, vector<1x8x72xf32>
    %49 = vector.shape_cast %48 : vector<1x8x72xf32> to vector<8x72xf32>
    %cst_19 = arith.constant dense<0.000000e+00> : vector<8x384xf32>
    %50 = tpu.matmul %49, %47, %cst_19 {dimension_numbers = #tpu.dot_dimension_numbers<[1], [0], [0], [1], [0, 0, 1, 1], [], []>} : vector<8x72xf32>, vector<72x384xf32>, vector<8x384xf32> -> vector<8x384xf32>
    %51 = vector.extract_strided_slice %27 {offsets = [0, 1], sizes = [8, 1], strides = [1, 1]} : vector<8x13xf32> to vector<8x1xf32>
    %52 = vector.broadcast %51 : vector<8x1xf32> to vector<8x384xf32>
    %53 = arith.addf %50, %52 : vector<8x384xf32>
    %54 = arith.mulf %53, %26 : vector<8x384xf32>
    %cst_20 = arith.constant dense<0.000000e+00> : vector<8xf32>
    %55 = vector.multi_reduction <add>, %54, %cst_20 [1] : vector<8x384xf32> to vector<8xf32>
    %56 = vector.shape_cast %55 : vector<8xf32> to vector<8x1xf32>
    %57 = arith.mulf %54, %53 : vector<8x384xf32>
    %cst_21 = arith.constant dense<0.000000e+00> : vector<8xf32>
    %58 = vector.multi_reduction <add>, %57, %cst_21 [1] : vector<8x384xf32> to vector<8xf32>
    %59 = vector.shape_cast %58 : vector<8xf32> to vector<8x1xf32>
    %c4_i32 = arith.constant 4 : i32
    %60 = tpu.dynamic_rotate %56 by %c4_i32 dim 0 : vector<8x1xf32>, i32 -> vector<8x1xf32>
    %61 = arith.addf %56, %60 : vector<8x1xf32>
    %c4_i32_22 = arith.constant 4 : i32
    %62 = tpu.dynamic_rotate %59 by %c4_i32_22 dim 0 : vector<8x1xf32>, i32 -> vector<8x1xf32>
    %63 = arith.addf %59, %62 : vector<8x1xf32>
    %cst_23 = arith.constant 0.001953125 : f32
    %64 = vector.broadcast %cst_23 : f32 to vector<8x1xf32>
    %65 = arith.mulf %61, %64 : vector<8x1xf32>
    %cst_24 = arith.constant 0.001953125 : f32
    %66 = vector.broadcast %cst_24 : f32 to vector<8x1xf32>
    %67 = arith.mulf %63, %66 : vector<8x1xf32>
    %68 = arith.mulf %65, %65 : vector<8x1xf32>
    %69 = arith.subf %67, %68 : vector<8x1xf32>
    %70 = vector.extract_strided_slice %27 {offsets = [0, 2], sizes = [8, 1], strides = [1, 1]} : vector<8x13xf32> to vector<8x1xf32>
    %cst_25 = arith.constant 9.99999974E-6 : f32
    %71 = vector.broadcast %cst_25 : f32 to vector<8x1xf32>
    %72 = arith.addf %69, %71 : vector<8x1xf32>
    %73 = math.rsqrt %72 : vector<8x1xf32>
    %74 = arith.mulf %70, %73 : vector<8x1xf32>
    %75 = vector.extract_strided_slice %27 {offsets = [0, 3], sizes = [8, 1], strides = [1, 1]} : vector<8x13xf32> to vector<8x1xf32>
    %76 = arith.mulf %65, %74 : vector<8x1xf32>
    %77 = arith.subf %75, %76 : vector<8x1xf32>
    %78 = vector.broadcast %74 : vector<8x1xf32> to vector<8x384xf32>
    %79 = arith.mulf %53, %78 : vector<8x384xf32>
    %80 = vector.broadcast %77 : vector<8x1xf32> to vector<8x384xf32>
    %81 = arith.addf %79, %80 : vector<8x384xf32>
    %cst_26 = arith.constant 5.000000e-01 : f32
    %82 = vector.broadcast %cst_26 : f32 to vector<8x384xf32>
    %83 = arith.mulf %82, %81 : vector<8x384xf32>
    %cst_27 = arith.constant 0.707106769 : f32
    %84 = vector.broadcast %cst_27 : f32 to vector<8x384xf32>
    %85 = arith.mulf %81, %84 : vector<8x384xf32>
    %cst_28 = arith.constant 0.000000e+00 : f32
    %86 = vector.broadcast %cst_28 : f32 to vector<8x384xf32>
    %87 = arith.cmpf olt, %85, %86 : vector<8x384xf32>
    %cst_29 = arith.constant -1.000000e+00 : f32
    %cst_30 = arith.constant 1.000000e+00 : f32
    %88 = vector.broadcast %cst_29 : f32 to vector<8x384xf32>
    %89 = vector.broadcast %cst_30 : f32 to vector<8x384xf32>
    %90 = arith.select %87, %88, %89 : vector<8x384xi1>, vector<8x384xf32>
    %91 = math.absf %85 : vector<8x384xf32>
    %cst_31 = arith.constant 0.327591091 : f32
    %92 = vector.broadcast %cst_31 : f32 to vector<8x384xf32>
    %93 = arith.mulf %92, %91 : vector<8x384xf32>
    %cst_32 = arith.constant 1.000000e+00 : f32
    %94 = vector.broadcast %cst_32 : f32 to vector<8x384xf32>
    %95 = arith.addf %94, %93 : vector<8x384xf32>
    %96 = tpu.reciprocal %95 {approx = true} : vector<8x384xf32> -> vector<8x384xf32>
    %cst_33 = arith.constant 1.06140542 : f32
    %97 = vector.broadcast %cst_33 : f32 to vector<8x384xf32>
    %98 = arith.mulf %97, %96 : vector<8x384xf32>
    %cst_34 = arith.constant -1.45315206 : f32
    %99 = vector.broadcast %cst_34 : f32 to vector<8x384xf32>
    %100 = arith.addf %98, %99 : vector<8x384xf32>
    %101 = arith.mulf %100, %96 : vector<8x384xf32>
    %cst_35 = arith.constant 1.42141378 : f32
    %102 = vector.broadcast %cst_35 : f32 to vector<8x384xf32>
    %103 = arith.addf %101, %102 : vector<8x384xf32>
    %104 = arith.mulf %103, %96 : vector<8x384xf32>
    %cst_36 = arith.constant -0.284496725 : f32
    %105 = vector.broadcast %cst_36 : f32 to vector<8x384xf32>
    %106 = arith.addf %104, %105 : vector<8x384xf32>
    %107 = arith.mulf %106, %96 : vector<8x384xf32>
    %cst_37 = arith.constant 0.254829586 : f32
    %108 = vector.broadcast %cst_37 : f32 to vector<8x384xf32>
    %109 = arith.addf %107, %108 : vector<8x384xf32>
    %110 = arith.mulf %109, %96 : vector<8x384xf32>
    %cst_38 = arith.constant 0.000000e+00 : f32
    %111 = vector.broadcast %cst_38 : f32 to vector<8x384xf32>
    %112 = arith.subf %111, %91 : vector<8x384xf32>
    %113 = arith.mulf %112, %91 : vector<8x384xf32>
    %114 = math.exp %113 : vector<8x384xf32>
    %115 = arith.mulf %110, %114 : vector<8x384xf32>
    %cst_39 = arith.constant 1.000000e+00 : f32
    %116 = vector.broadcast %cst_39 : f32 to vector<8x384xf32>
    %117 = arith.subf %116, %115 : vector<8x384xf32>
    %118 = arith.mulf %90, %117 : vector<8x384xf32>
    %cst_40 = arith.constant 1.000000e+00 : f32
    %119 = vector.broadcast %cst_40 : f32 to vector<8x384xf32>
    %120 = arith.addf %119, %118 : vector<8x384xf32>
    %121 = arith.mulf %83, %120 : vector<8x384xf32>
    %122 = arith.mulf %121, %26 : vector<8x384xf32>
    %c19_i32_41 = arith.constant 19 : i32
    %123 = tpu.dynamic_rotate %122 by %c19_i32_41 dim 1 : vector<8x384xf32>, i32 -> vector<8x384xf32>
    %c18_i32_42 = arith.constant 18 : i32
    %124 = tpu.dynamic_rotate %122 by %c18_i32_42 dim 1 : vector<8x384xf32>, i32 -> vector<8x384xf32>
    %c17_i32_43 = arith.constant 17 : i32
    %125 = tpu.dynamic_rotate %122 by %c17_i32_43 dim 1 : vector<8x384xf32>, i32 -> vector<8x384xf32>
    %c1_i32_44 = arith.constant 1 : i32
    %126 = tpu.dynamic_rotate %122 by %c1_i32_44 dim 1 : vector<8x384xf32>, i32 -> vector<8x384xf32>
    %c383_i32_45 = arith.constant 383 : i32
    %127 = tpu.dynamic_rotate %122 by %c383_i32_45 dim 1 : vector<8x384xf32>, i32 -> vector<8x384xf32>
    %c367_i32_46 = arith.constant 367 : i32
    %128 = tpu.dynamic_rotate %122 by %c367_i32_46 dim 1 : vector<8x384xf32>, i32 -> vector<8x384xf32>
    %c366_i32_47 = arith.constant 366 : i32
    %129 = tpu.dynamic_rotate %122 by %c366_i32_47 dim 1 : vector<8x384xf32>, i32 -> vector<8x384xf32>
    %c365_i32_48 = arith.constant 365 : i32
    %130 = tpu.dynamic_rotate %122 by %c365_i32_48 dim 1 : vector<8x384xf32>, i32 -> vector<8x384xf32>
    %131 = tpu.concatenate %123, %124, %125, %126, %122, %127, %128, %129, %130 in 0 : vector<8x384xf32>, vector<8x384xf32>, vector<8x384xf32>, vector<8x384xf32>, vector<8x384xf32>, vector<8x384xf32>, vector<8x384xf32>, vector<8x384xf32>, vector<8x384xf32> -> vector<72x384xf32>
    %c1 = arith.constant 1 : index
    %c0_49 = arith.constant 0 : index
    %c0_50 = arith.constant 0 : index
    %132 = vector.load %arg3[%c1, %c0_49, %c0_50] : memref<4x8x72xf32, #tpu.memory_space<vmem>>, vector<1x8x72xf32>
    %133 = vector.shape_cast %132 : vector<1x8x72xf32> to vector<8x72xf32>
    %cst_51 = arith.constant dense<0.000000e+00> : vector<8x384xf32>
    %134 = tpu.matmul %133, %131, %cst_51 {dimension_numbers = #tpu.dot_dimension_numbers<[1], [0], [0], [1], [0, 0, 1, 1], [], []>} : vector<8x72xf32>, vector<72x384xf32>, vector<8x384xf32> -> vector<8x384xf32>
    %135 = vector.extract_strided_slice %27 {offsets = [0, 4], sizes = [8, 1], strides = [1, 1]} : vector<8x13xf32> to vector<8x1xf32>
    %136 = vector.broadcast %135 : vector<8x1xf32> to vector<8x384xf32>
    %137 = arith.addf %134, %136 : vector<8x384xf32>
    %138 = arith.mulf %137, %26 : vector<8x384xf32>
    %cst_52 = arith.constant dense<0.000000e+00> : vector<8xf32>
    %139 = vector.multi_reduction <add>, %138, %cst_52 [1] : vector<8x384xf32> to vector<8xf32>
    %140 = vector.shape_cast %139 : vector<8xf32> to vector<8x1xf32>
    %141 = arith.mulf %138, %137 : vector<8x384xf32>
    %cst_53 = arith.constant dense<0.000000e+00> : vector<8xf32>
    %142 = vector.multi_reduction <add>, %141, %cst_53 [1] : vector<8x384xf32> to vector<8xf32>
    %143 = vector.shape_cast %142 : vector<8xf32> to vector<8x1xf32>
    %c4_i32_54 = arith.constant 4 : i32
    %144 = tpu.dynamic_rotate %140 by %c4_i32_54 dim 0 : vector<8x1xf32>, i32 -> vector<8x1xf32>
    %145 = arith.addf %140, %144 : vector<8x1xf32>
    %c4_i32_55 = arith.constant 4 : i32
    %146 = tpu.dynamic_rotate %143 by %c4_i32_55 dim 0 : vector<8x1xf32>, i32 -> vector<8x1xf32>
    %147 = arith.addf %143, %146 : vector<8x1xf32>
    %cst_56 = arith.constant 0.001953125 : f32
    %148 = vector.broadcast %cst_56 : f32 to vector<8x1xf32>
    %149 = arith.mulf %145, %148 : vector<8x1xf32>
    %cst_57 = arith.constant 0.001953125 : f32
    %150 = vector.broadcast %cst_57 : f32 to vector<8x1xf32>
    %151 = arith.mulf %147, %150 : vector<8x1xf32>
    %152 = arith.mulf %149, %149 : vector<8x1xf32>
    %153 = arith.subf %151, %152 : vector<8x1xf32>
    %154 = vector.extract_strided_slice %27 {offsets = [0, 5], sizes = [8, 1], strides = [1, 1]} : vector<8x13xf32> to vector<8x1xf32>
    %cst_58 = arith.constant 9.99999974E-6 : f32
    %155 = vector.broadcast %cst_58 : f32 to vector<8x1xf32>
    %156 = arith.addf %153, %155 : vector<8x1xf32>
    %157 = math.rsqrt %156 : vector<8x1xf32>
    %158 = arith.mulf %154, %157 : vector<8x1xf32>
    %159 = vector.extract_strided_slice %27 {offsets = [0, 6], sizes = [8, 1], strides = [1, 1]} : vector<8x13xf32> to vector<8x1xf32>
    %160 = arith.mulf %149, %158 : vector<8x1xf32>
    %161 = arith.subf %159, %160 : vector<8x1xf32>
    %162 = vector.broadcast %158 : vector<8x1xf32> to vector<8x384xf32>
    %163 = arith.mulf %137, %162 : vector<8x384xf32>
    %164 = vector.broadcast %161 : vector<8x1xf32> to vector<8x384xf32>
    %165 = arith.addf %163, %164 : vector<8x384xf32>
    %cst_59 = arith.constant 5.000000e-01 : f32
    %166 = vector.broadcast %cst_59 : f32 to vector<8x384xf32>
    %167 = arith.mulf %166, %165 : vector<8x384xf32>
    %cst_60 = arith.constant 0.707106769 : f32
    %168 = vector.broadcast %cst_60 : f32 to vector<8x384xf32>
    %169 = arith.mulf %165, %168 : vector<8x384xf32>
    %cst_61 = arith.constant 0.000000e+00 : f32
    %170 = vector.broadcast %cst_61 : f32 to vector<8x384xf32>
    %171 = arith.cmpf olt, %169, %170 : vector<8x384xf32>
    %cst_62 = arith.constant -1.000000e+00 : f32
    %cst_63 = arith.constant 1.000000e+00 : f32
    %172 = vector.broadcast %cst_62 : f32 to vector<8x384xf32>
    %173 = vector.broadcast %cst_63 : f32 to vector<8x384xf32>
    %174 = arith.select %171, %172, %173 : vector<8x384xi1>, vector<8x384xf32>
    %175 = math.absf %169 : vector<8x384xf32>
    %cst_64 = arith.constant 0.327591091 : f32
    %176 = vector.broadcast %cst_64 : f32 to vector<8x384xf32>
    %177 = arith.mulf %176, %175 : vector<8x384xf32>
    %cst_65 = arith.constant 1.000000e+00 : f32
    %178 = vector.broadcast %cst_65 : f32 to vector<8x384xf32>
    %179 = arith.addf %178, %177 : vector<8x384xf32>
    %180 = tpu.reciprocal %179 {approx = true} : vector<8x384xf32> -> vector<8x384xf32>
    %cst_66 = arith.constant 1.06140542 : f32
    %181 = vector.broadcast %cst_66 : f32 to vector<8x384xf32>
    %182 = arith.mulf %181, %180 : vector<8x384xf32>
    %cst_67 = arith.constant -1.45315206 : f32
    %183 = vector.broadcast %cst_67 : f32 to vector<8x384xf32>
    %184 = arith.addf %182, %183 : vector<8x384xf32>
    %185 = arith.mulf %184, %180 : vector<8x384xf32>
    %cst_68 = arith.constant 1.42141378 : f32
    %186 = vector.broadcast %cst_68 : f32 to vector<8x384xf32>
    %187 = arith.addf %185, %186 : vector<8x384xf32>
    %188 = arith.mulf %187, %180 : vector<8x384xf32>
    %cst_69 = arith.constant -0.284496725 : f32
    %189 = vector.broadcast %cst_69 : f32 to vector<8x384xf32>
    %190 = arith.addf %188, %189 : vector<8x384xf32>
    %191 = arith.mulf %190, %180 : vector<8x384xf32>
    %cst_70 = arith.constant 0.254829586 : f32
    %192 = vector.broadcast %cst_70 : f32 to vector<8x384xf32>
    %193 = arith.addf %191, %192 : vector<8x384xf32>
    %194 = arith.mulf %193, %180 : vector<8x384xf32>
    %cst_71 = arith.constant 0.000000e+00 : f32
    %195 = vector.broadcast %cst_71 : f32 to vector<8x384xf32>
    %196 = arith.subf %195, %175 : vector<8x384xf32>
    %197 = arith.mulf %196, %175 : vector<8x384xf32>
    %198 = math.exp %197 : vector<8x384xf32>
    %199 = arith.mulf %194, %198 : vector<8x384xf32>
    %cst_72 = arith.constant 1.000000e+00 : f32
    %200 = vector.broadcast %cst_72 : f32 to vector<8x384xf32>
    %201 = arith.subf %200, %199 : vector<8x384xf32>
    %202 = arith.mulf %174, %201 : vector<8x384xf32>
    %cst_73 = arith.constant 1.000000e+00 : f32
    %203 = vector.broadcast %cst_73 : f32 to vector<8x384xf32>
    %204 = arith.addf %203, %202 : vector<8x384xf32>
    %205 = arith.mulf %167, %204 : vector<8x384xf32>
    %206 = arith.mulf %205, %26 : vector<8x384xf32>
    %c19_i32_74 = arith.constant 19 : i32
    %207 = tpu.dynamic_rotate %206 by %c19_i32_74 dim 1 : vector<8x384xf32>, i32 -> vector<8x384xf32>
    %c18_i32_75 = arith.constant 18 : i32
    %208 = tpu.dynamic_rotate %206 by %c18_i32_75 dim 1 : vector<8x384xf32>, i32 -> vector<8x384xf32>
    %c17_i32_76 = arith.constant 17 : i32
    %209 = tpu.dynamic_rotate %206 by %c17_i32_76 dim 1 : vector<8x384xf32>, i32 -> vector<8x384xf32>
    %c1_i32_77 = arith.constant 1 : i32
    %210 = tpu.dynamic_rotate %206 by %c1_i32_77 dim 1 : vector<8x384xf32>, i32 -> vector<8x384xf32>
    %c383_i32_78 = arith.constant 383 : i32
    %211 = tpu.dynamic_rotate %206 by %c383_i32_78 dim 1 : vector<8x384xf32>, i32 -> vector<8x384xf32>
    %c367_i32_79 = arith.constant 367 : i32
    %212 = tpu.dynamic_rotate %206 by %c367_i32_79 dim 1 : vector<8x384xf32>, i32 -> vector<8x384xf32>
    %c366_i32_80 = arith.constant 366 : i32
    %213 = tpu.dynamic_rotate %206 by %c366_i32_80 dim 1 : vector<8x384xf32>, i32 -> vector<8x384xf32>
    %c365_i32_81 = arith.constant 365 : i32
    %214 = tpu.dynamic_rotate %206 by %c365_i32_81 dim 1 : vector<8x384xf32>, i32 -> vector<8x384xf32>
    %215 = tpu.concatenate %207, %208, %209, %210, %206, %211, %212, %213, %214 in 0 : vector<8x384xf32>, vector<8x384xf32>, vector<8x384xf32>, vector<8x384xf32>, vector<8x384xf32>, vector<8x384xf32>, vector<8x384xf32>, vector<8x384xf32>, vector<8x384xf32> -> vector<72x384xf32>
    %c2 = arith.constant 2 : index
    %c0_82 = arith.constant 0 : index
    %c0_83 = arith.constant 0 : index
    %216 = vector.load %arg3[%c2, %c0_82, %c0_83] : memref<4x8x72xf32, #tpu.memory_space<vmem>>, vector<1x8x72xf32>
    %217 = vector.shape_cast %216 : vector<1x8x72xf32> to vector<8x72xf32>
    %cst_84 = arith.constant dense<0.000000e+00> : vector<8x384xf32>
    %218 = tpu.matmul %217, %215, %cst_84 {dimension_numbers = #tpu.dot_dimension_numbers<[1], [0], [0], [1], [0, 0, 1, 1], [], []>} : vector<8x72xf32>, vector<72x384xf32>, vector<8x384xf32> -> vector<8x384xf32>
    %219 = vector.extract_strided_slice %27 {offsets = [0, 7], sizes = [8, 1], strides = [1, 1]} : vector<8x13xf32> to vector<8x1xf32>
    %220 = vector.broadcast %219 : vector<8x1xf32> to vector<8x384xf32>
    %221 = arith.addf %218, %220 : vector<8x384xf32>
    %222 = arith.mulf %221, %26 : vector<8x384xf32>
    %cst_85 = arith.constant dense<0.000000e+00> : vector<8xf32>
    %223 = vector.multi_reduction <add>, %222, %cst_85 [1] : vector<8x384xf32> to vector<8xf32>
    %224 = vector.shape_cast %223 : vector<8xf32> to vector<8x1xf32>
    %225 = arith.mulf %222, %221 : vector<8x384xf32>
    %cst_86 = arith.constant dense<0.000000e+00> : vector<8xf32>
    %226 = vector.multi_reduction <add>, %225, %cst_86 [1] : vector<8x384xf32> to vector<8xf32>
    %227 = vector.shape_cast %226 : vector<8xf32> to vector<8x1xf32>
    %c4_i32_87 = arith.constant 4 : i32
    %228 = tpu.dynamic_rotate %224 by %c4_i32_87 dim 0 : vector<8x1xf32>, i32 -> vector<8x1xf32>
    %229 = arith.addf %224, %228 : vector<8x1xf32>
    %c4_i32_88 = arith.constant 4 : i32
    %230 = tpu.dynamic_rotate %227 by %c4_i32_88 dim 0 : vector<8x1xf32>, i32 -> vector<8x1xf32>
    %231 = arith.addf %227, %230 : vector<8x1xf32>
    %cst_89 = arith.constant 0.001953125 : f32
    %232 = vector.broadcast %cst_89 : f32 to vector<8x1xf32>
    %233 = arith.mulf %229, %232 : vector<8x1xf32>
    %cst_90 = arith.constant 0.001953125 : f32
    %234 = vector.broadcast %cst_90 : f32 to vector<8x1xf32>
    %235 = arith.mulf %231, %234 : vector<8x1xf32>
    %236 = arith.mulf %233, %233 : vector<8x1xf32>
    %237 = arith.subf %235, %236 : vector<8x1xf32>
    %238 = vector.extract_strided_slice %27 {offsets = [0, 8], sizes = [8, 1], strides = [1, 1]} : vector<8x13xf32> to vector<8x1xf32>
    %cst_91 = arith.constant 9.99999974E-6 : f32
    %239 = vector.broadcast %cst_91 : f32 to vector<8x1xf32>
    %240 = arith.addf %237, %239 : vector<8x1xf32>
    %241 = math.rsqrt %240 : vector<8x1xf32>
    %242 = arith.mulf %238, %241 : vector<8x1xf32>
    %243 = vector.extract_strided_slice %27 {offsets = [0, 9], sizes = [8, 1], strides = [1, 1]} : vector<8x13xf32> to vector<8x1xf32>
    %244 = arith.mulf %233, %242 : vector<8x1xf32>
    %245 = arith.subf %243, %244 : vector<8x1xf32>
    %246 = vector.broadcast %242 : vector<8x1xf32> to vector<8x384xf32>
    %247 = arith.mulf %221, %246 : vector<8x384xf32>
    %248 = vector.broadcast %245 : vector<8x1xf32> to vector<8x384xf32>
    %249 = arith.addf %247, %248 : vector<8x384xf32>
    %cst_92 = arith.constant 5.000000e-01 : f32
    %250 = vector.broadcast %cst_92 : f32 to vector<8x384xf32>
    %251 = arith.mulf %250, %249 : vector<8x384xf32>
    %cst_93 = arith.constant 0.707106769 : f32
    %252 = vector.broadcast %cst_93 : f32 to vector<8x384xf32>
    %253 = arith.mulf %249, %252 : vector<8x384xf32>
    %cst_94 = arith.constant 0.000000e+00 : f32
    %254 = vector.broadcast %cst_94 : f32 to vector<8x384xf32>
    %255 = arith.cmpf olt, %253, %254 : vector<8x384xf32>
    %cst_95 = arith.constant -1.000000e+00 : f32
    %cst_96 = arith.constant 1.000000e+00 : f32
    %256 = vector.broadcast %cst_95 : f32 to vector<8x384xf32>
    %257 = vector.broadcast %cst_96 : f32 to vector<8x384xf32>
    %258 = arith.select %255, %256, %257 : vector<8x384xi1>, vector<8x384xf32>
    %259 = math.absf %253 : vector<8x384xf32>
    %cst_97 = arith.constant 0.327591091 : f32
    %260 = vector.broadcast %cst_97 : f32 to vector<8x384xf32>
    %261 = arith.mulf %260, %259 : vector<8x384xf32>
    %cst_98 = arith.constant 1.000000e+00 : f32
    %262 = vector.broadcast %cst_98 : f32 to vector<8x384xf32>
    %263 = arith.addf %262, %261 : vector<8x384xf32>
    %264 = tpu.reciprocal %263 {approx = true} : vector<8x384xf32> -> vector<8x384xf32>
    %cst_99 = arith.constant 1.06140542 : f32
    %265 = vector.broadcast %cst_99 : f32 to vector<8x384xf32>
    %266 = arith.mulf %265, %264 : vector<8x384xf32>
    %cst_100 = arith.constant -1.45315206 : f32
    %267 = vector.broadcast %cst_100 : f32 to vector<8x384xf32>
    %268 = arith.addf %266, %267 : vector<8x384xf32>
    %269 = arith.mulf %268, %264 : vector<8x384xf32>
    %cst_101 = arith.constant 1.42141378 : f32
    %270 = vector.broadcast %cst_101 : f32 to vector<8x384xf32>
    %271 = arith.addf %269, %270 : vector<8x384xf32>
    %272 = arith.mulf %271, %264 : vector<8x384xf32>
    %cst_102 = arith.constant -0.284496725 : f32
    %273 = vector.broadcast %cst_102 : f32 to vector<8x384xf32>
    %274 = arith.addf %272, %273 : vector<8x384xf32>
    %275 = arith.mulf %274, %264 : vector<8x384xf32>
    %cst_103 = arith.constant 0.254829586 : f32
    %276 = vector.broadcast %cst_103 : f32 to vector<8x384xf32>
    %277 = arith.addf %275, %276 : vector<8x384xf32>
    %278 = arith.mulf %277, %264 : vector<8x384xf32>
    %cst_104 = arith.constant 0.000000e+00 : f32
    %279 = vector.broadcast %cst_104 : f32 to vector<8x384xf32>
    %280 = arith.subf %279, %259 : vector<8x384xf32>
    %281 = arith.mulf %280, %259 : vector<8x384xf32>
    %282 = math.exp %281 : vector<8x384xf32>
    %283 = arith.mulf %278, %282 : vector<8x384xf32>
    %cst_105 = arith.constant 1.000000e+00 : f32
    %284 = vector.broadcast %cst_105 : f32 to vector<8x384xf32>
    %285 = arith.subf %284, %283 : vector<8x384xf32>
    %286 = arith.mulf %258, %285 : vector<8x384xf32>
    %cst_106 = arith.constant 1.000000e+00 : f32
    %287 = vector.broadcast %cst_106 : f32 to vector<8x384xf32>
    %288 = arith.addf %287, %286 : vector<8x384xf32>
    %289 = arith.mulf %251, %288 : vector<8x384xf32>
    %290 = arith.mulf %289, %26 : vector<8x384xf32>
    %c19_i32_107 = arith.constant 19 : i32
    %291 = tpu.dynamic_rotate %290 by %c19_i32_107 dim 1 : vector<8x384xf32>, i32 -> vector<8x384xf32>
    %c18_i32_108 = arith.constant 18 : i32
    %292 = tpu.dynamic_rotate %290 by %c18_i32_108 dim 1 : vector<8x384xf32>, i32 -> vector<8x384xf32>
    %c17_i32_109 = arith.constant 17 : i32
    %293 = tpu.dynamic_rotate %290 by %c17_i32_109 dim 1 : vector<8x384xf32>, i32 -> vector<8x384xf32>
    %c1_i32_110 = arith.constant 1 : i32
    %294 = tpu.dynamic_rotate %290 by %c1_i32_110 dim 1 : vector<8x384xf32>, i32 -> vector<8x384xf32>
    %c383_i32_111 = arith.constant 383 : i32
    %295 = tpu.dynamic_rotate %290 by %c383_i32_111 dim 1 : vector<8x384xf32>, i32 -> vector<8x384xf32>
    %c367_i32_112 = arith.constant 367 : i32
    %296 = tpu.dynamic_rotate %290 by %c367_i32_112 dim 1 : vector<8x384xf32>, i32 -> vector<8x384xf32>
    %c366_i32_113 = arith.constant 366 : i32
    %297 = tpu.dynamic_rotate %290 by %c366_i32_113 dim 1 : vector<8x384xf32>, i32 -> vector<8x384xf32>
    %c365_i32_114 = arith.constant 365 : i32
    %298 = tpu.dynamic_rotate %290 by %c365_i32_114 dim 1 : vector<8x384xf32>, i32 -> vector<8x384xf32>
    %299 = tpu.concatenate %291, %292, %293, %294, %290, %295, %296, %297, %298 in 0 : vector<8x384xf32>, vector<8x384xf32>, vector<8x384xf32>, vector<8x384xf32>, vector<8x384xf32>, vector<8x384xf32>, vector<8x384xf32>, vector<8x384xf32>, vector<8x384xf32> -> vector<72x384xf32>
    %c3 = arith.constant 3 : index
    %c0_115 = arith.constant 0 : index
    %c0_116 = arith.constant 0 : index
    %300 = vector.load %arg3[%c3, %c0_115, %c0_116] : memref<4x8x72xf32, #tpu.memory_space<vmem>>, vector<1x8x72xf32>
    %301 = vector.shape_cast %300 : vector<1x8x72xf32> to vector<8x72xf32>
    %cst_117 = arith.constant dense<0.000000e+00> : vector<8x384xf32>
    %302 = tpu.matmul %301, %299, %cst_117 {dimension_numbers = #tpu.dot_dimension_numbers<[1], [0], [0], [1], [0, 0, 1, 1], [], []>} : vector<8x72xf32>, vector<72x384xf32>, vector<8x384xf32> -> vector<8x384xf32>
    %303 = vector.extract_strided_slice %27 {offsets = [0, 10], sizes = [8, 1], strides = [1, 1]} : vector<8x13xf32> to vector<8x1xf32>
    %304 = vector.broadcast %303 : vector<8x1xf32> to vector<8x384xf32>
    %305 = arith.addf %302, %304 : vector<8x384xf32>
    %306 = arith.mulf %305, %26 : vector<8x384xf32>
    %cst_118 = arith.constant dense<0.000000e+00> : vector<8xf32>
    %307 = vector.multi_reduction <add>, %306, %cst_118 [1] : vector<8x384xf32> to vector<8xf32>
    %308 = vector.shape_cast %307 : vector<8xf32> to vector<8x1xf32>
    %309 = arith.mulf %306, %305 : vector<8x384xf32>
    %cst_119 = arith.constant dense<0.000000e+00> : vector<8xf32>
    %310 = vector.multi_reduction <add>, %309, %cst_119 [1] : vector<8x384xf32> to vector<8xf32>
    %311 = vector.shape_cast %310 : vector<8xf32> to vector<8x1xf32>
    %c4_i32_120 = arith.constant 4 : i32
    %312 = tpu.dynamic_rotate %308 by %c4_i32_120 dim 0 : vector<8x1xf32>, i32 -> vector<8x1xf32>
    %313 = arith.addf %308, %312 : vector<8x1xf32>
    %c4_i32_121 = arith.constant 4 : i32
    %314 = tpu.dynamic_rotate %311 by %c4_i32_121 dim 0 : vector<8x1xf32>, i32 -> vector<8x1xf32>
    %315 = arith.addf %311, %314 : vector<8x1xf32>
    %cst_122 = arith.constant 0.001953125 : f32
    %316 = vector.broadcast %cst_122 : f32 to vector<8x1xf32>
    %317 = arith.mulf %313, %316 : vector<8x1xf32>
    %cst_123 = arith.constant 0.001953125 : f32
    %318 = vector.broadcast %cst_123 : f32 to vector<8x1xf32>
    %319 = arith.mulf %315, %318 : vector<8x1xf32>
    %320 = arith.mulf %317, %317 : vector<8x1xf32>
    %321 = arith.subf %319, %320 : vector<8x1xf32>
    %322 = vector.extract_strided_slice %27 {offsets = [0, 11], sizes = [8, 1], strides = [1, 1]} : vector<8x13xf32> to vector<8x1xf32>
    %cst_124 = arith.constant 9.99999974E-6 : f32
    %323 = vector.broadcast %cst_124 : f32 to vector<8x1xf32>
    %324 = arith.addf %321, %323 : vector<8x1xf32>
    %325 = math.rsqrt %324 : vector<8x1xf32>
    %326 = arith.mulf %322, %325 : vector<8x1xf32>
    %327 = vector.extract_strided_slice %27 {offsets = [0, 12], sizes = [8, 1], strides = [1, 1]} : vector<8x13xf32> to vector<8x1xf32>
    %328 = arith.mulf %317, %326 : vector<8x1xf32>
    %329 = arith.subf %327, %328 : vector<8x1xf32>
    %330 = vector.broadcast %326 : vector<8x1xf32> to vector<8x384xf32>
    %331 = arith.mulf %305, %330 : vector<8x384xf32>
    %332 = vector.broadcast %329 : vector<8x1xf32> to vector<8x384xf32>
    %333 = arith.addf %331, %332 : vector<8x384xf32>
    %cst_125 = arith.constant 5.000000e-01 : f32
    %334 = vector.broadcast %cst_125 : f32 to vector<8x384xf32>
    %335 = arith.mulf %334, %333 : vector<8x384xf32>
    %cst_126 = arith.constant 0.707106769 : f32
    %336 = vector.broadcast %cst_126 : f32 to vector<8x384xf32>
    %337 = arith.mulf %333, %336 : vector<8x384xf32>
    %cst_127 = arith.constant 0.000000e+00 : f32
    %338 = vector.broadcast %cst_127 : f32 to vector<8x384xf32>
    %339 = arith.cmpf olt, %337, %338 : vector<8x384xf32>
    %cst_128 = arith.constant -1.000000e+00 : f32
    %cst_129 = arith.constant 1.000000e+00 : f32
    %340 = vector.broadcast %cst_128 : f32 to vector<8x384xf32>
    %341 = vector.broadcast %cst_129 : f32 to vector<8x384xf32>
    %342 = arith.select %339, %340, %341 : vector<8x384xi1>, vector<8x384xf32>
    %343 = math.absf %337 : vector<8x384xf32>
    %cst_130 = arith.constant 0.327591091 : f32
    %344 = vector.broadcast %cst_130 : f32 to vector<8x384xf32>
    %345 = arith.mulf %344, %343 : vector<8x384xf32>
    %cst_131 = arith.constant 1.000000e+00 : f32
    %346 = vector.broadcast %cst_131 : f32 to vector<8x384xf32>
    %347 = arith.addf %346, %345 : vector<8x384xf32>
    %348 = tpu.reciprocal %347 {approx = true} : vector<8x384xf32> -> vector<8x384xf32>
    %cst_132 = arith.constant 1.06140542 : f32
    %349 = vector.broadcast %cst_132 : f32 to vector<8x384xf32>
    %350 = arith.mulf %349, %348 : vector<8x384xf32>
    %cst_133 = arith.constant -1.45315206 : f32
    %351 = vector.broadcast %cst_133 : f32 to vector<8x384xf32>
    %352 = arith.addf %350, %351 : vector<8x384xf32>
    %353 = arith.mulf %352, %348 : vector<8x384xf32>
    %cst_134 = arith.constant 1.42141378 : f32
    %354 = vector.broadcast %cst_134 : f32 to vector<8x384xf32>
    %355 = arith.addf %353, %354 : vector<8x384xf32>
    %356 = arith.mulf %355, %348 : vector<8x384xf32>
    %cst_135 = arith.constant -0.284496725 : f32
    %357 = vector.broadcast %cst_135 : f32 to vector<8x384xf32>
    %358 = arith.addf %356, %357 : vector<8x384xf32>
    %359 = arith.mulf %358, %348 : vector<8x384xf32>
    %cst_136 = arith.constant 0.254829586 : f32
    %360 = vector.broadcast %cst_136 : f32 to vector<8x384xf32>
    %361 = arith.addf %359, %360 : vector<8x384xf32>
    %362 = arith.mulf %361, %348 : vector<8x384xf32>
    %cst_137 = arith.constant 0.000000e+00 : f32
    %363 = vector.broadcast %cst_137 : f32 to vector<8x384xf32>
    %364 = arith.subf %363, %343 : vector<8x384xf32>
    %365 = arith.mulf %364, %343 : vector<8x384xf32>
    %366 = math.exp %365 : vector<8x384xf32>
    %367 = arith.mulf %362, %366 : vector<8x384xf32>
    %cst_138 = arith.constant 1.000000e+00 : f32
    %368 = vector.broadcast %cst_138 : f32 to vector<8x384xf32>
    %369 = arith.subf %368, %367 : vector<8x384xf32>
    %370 = arith.mulf %342, %369 : vector<8x384xf32>
    %cst_139 = arith.constant 1.000000e+00 : f32
    %371 = vector.broadcast %cst_139 : f32 to vector<8x384xf32>
    %372 = arith.addf %371, %370 : vector<8x384xf32>
    %373 = arith.mulf %335, %372 : vector<8x384xf32>
    %374 = arith.mulf %373, %26 : vector<8x384xf32>
    %c0_140 = arith.constant 0 : index
    %c0_141 = arith.constant 0 : index
    %375 = vector.load %arg5[%c0_140, %c0_141] : memref<8x384xf32, #tpu.memory_space<vmem>>, vector<8x384xf32>
    tpu.vector_store %arg5[%c0_140, %c0_141], %374 {strides = array<i32>} : memref<8x384xf32, #tpu.memory_space<vmem>>, vector<8x384xf32>,
    return
  }
  func.func @transform_0(%arg0: i32) -> (i32, i32) {
    %c0_i32 = arith.constant 0 : i32
    %c0_i32_0 = arith.constant 0 : i32
    %c0_i32_1 = arith.constant 0 : i32
    return %c0_i32, %c0_i32_0 : i32, i32
  }
  func.func @transform_1(%arg0: i32) -> (i32, i32) {
    %c0_i32 = arith.constant 0 : i32
    %c0_i32_0 = arith.constant 0 : i32
    %c0_i32_1 = arith.constant 0 : i32
    return %c0_i32, %c0_i32_0 : i32, i32
  }
  func.func @transform_2(%arg0: i32) -> (i32, i32, i32) {
    %c0_i32 = arith.constant 0 : i32
    %c0_i32_0 = arith.constant 0 : i32
    %c0_i32_1 = arith.constant 0 : i32
    %c0_i32_2 = arith.constant 0 : i32
    return %c0_i32, %c0_i32_0, %c0_i32_1 : i32, i32, i32
  }
  func.func @transform_3(%arg0: i32) -> (i32, i32) {
    %c0_i32 = arith.constant 0 : i32
    %c0_i32_0 = arith.constant 0 : i32
    %c0_i32_1 = arith.constant 0 : i32
    return %c0_i32, %c0_i32_0 : i32, i32
  }
  func.func @transform_4(%arg0: i32) -> (i32, i32) {
    %c0_i32 = arith.constant 0 : i32
    %c0_i32_0 = arith.constant 0 : i32
    %c0_i32_1 = arith.constant 0 : i32
    return %c0_i32, %c0_i32_0 : i32, i32
  }
}

</mosaic_0001>

<bundles_post_ra>
// kernel: tile.0
= control target key start
LH: loop header
LB: loop body
LE: loop exit
PB: predicated region body
PF: predicated region fallthrough
CT: control target
= control target key end

     0   :  { %s34_s8 = smov 125   ;;  %vm7_vm0 = vcmask 7168   ;;  %s35_s11 = smov 126   ;;  %s61_s0 = inlined_call_operand.vmem [shape: f32[2,4], index: 0, kind: input, shape index: {}]   ;;  %s62_s1 = inlined_call_operand.vmem [shape: f32[8,1], index: 1, kind: output, shape index: {}]  }
   0x1   :  { %v4_v0 = vld [vmem:[%s61_s0] sm:$0x3]  ;;  %s33_s0 = smov 127  }
   0x2   :  { %5 = vst [vmem:[#allocation0] sm:$0x3] %v4_v0 }
   0x9   :  { %v9_v1 = vld [vmem:[#allocation0] sm:$0x3]  }
   0xa   :  { %v21_v2 = vld [vmem:[#allocation0] sm:$0x3]   ;;  %10 = vrot.lane.b32.xlu0 %v9_v1, %s33_s0 }
   0xb   :  { %22 = vrot.lane.b32.xlu1 %v21_v2, %s34_s8  ;;  %v6_v3 = vld [vmem:[#allocation0] sm:$0x3]  }
   0xc   :  { %v15_v4 = vld [vmem:[#allocation0] sm:$0x3]   ;;  %8 = vst.msk [vmem:[%s62_s1] ss:$4 sm:$0x3] %vm7_vm0, %v6_v3  }
   0xe   :  { %16 = vrot.lane.b32.xlu0 %v15_v4, %s35_s11 }
  0x7c   :  { %v11_v5 = vpop.permute.xlu0 %10  }
  0x7d   :  { %v23_v6 = vpop.permute.xlu1 %22   ;;  %27 = vst.msk [vmem:[%s62_s1 + $0x1] ss:$4 sm:$0x3] %vm7_vm0, %v11_v5  }
  0x7e   :  { %29 = vst.msk [vmem:[%s62_s1 + $0x3] ss:$4 sm:$0x3] %vm7_vm0, %v23_v6  }
  0x80   :  { %v17_v7 = vpop.permute.xlu0 %16  }
  0x81   :  { %28 = vst.msk [vmem:[%s62_s1 + $0x2] ss:$4 sm:$0x3] %vm7_vm0, %v17_v7  }

// kernel: tile.68
= control target key start
LH: loop header
LB: loop body
LE: loop exit
PB: predicated region body
PF: predicated region fallthrough
CT: control target
= control target key end

     0   :  { %s22_s0 = inlined_call_operand.vmem [shape: f32[4], index: 0, kind: input, shape index: {}]   ;;  %s23_s1 = inlined_call_operand.vmem [shape: f32[2,4], index: 1, kind: output, shape index: {}]  }
   0x1   :  { %v4_v0 = vld [vmem:[%s22_s0] ss:$0 sm:$0xff] }
   0x2   :  { %5 = vst [vmem:[%s23_s1] sm:$0x3] %v4_v0 }

// kernel: unet_up_forward.1
= control target key start
LH: loop header
LB: loop body
LE: loop exit
PB: predicated region body
PF: predicated region fallthrough
CT: control target
= control target key end

     0   :  { %v2328_v3 = vmov 0.0|0.0   ;;  %s2329_s27 = smov 1   ;;  %s2330_s28 = smov 18   ;;  %v2331_v13 = vmov 0.0   ;;  %vm3062_vm0 = vmmov 0   ;;  %v2334_v14 = vmov 0   ;;  %s3057_s0 = inlined_call_operand.vmem [shape: f32[16,384], index: 0, kind: input, shape index: {}]   ;;  %s3058_s3 = inlined_call_operand.vmem [shape: f32[8,13], index: 3, kind: input, shape index: {}]   ;;  %s3059_s1 = inlined_call_operand.vmem [shape: f32[8,64], index: 1, kind: input, shape index: {}]   ;;  %s3060_s2 = inlined_call_operand.vmem [shape: f32[4,8,72], index: 2, kind: input, shape index: {}]   ;;  %s3061_s4 = inlined_call_operand.vmem [shape: f32[8,384], index: 4, kind: output, shape index: {}]  }
   0x1   :  { %v72_v0 = vld [vmem:[%s3057_s0 + $0x10] sm:$0xff]  ;;  %v75_v1 = vld [vmem:[%s3057_s0 + $0x28] sm:$0xff]  ;;  %v70_v2 = vld [vmem:[%s3057_s0] sm:$0xff]  ;;  %1911 = vmatprep.subr.bf16.mxu1 %v2328_v3  ;;  %207 = vmatprep.mubr.f32.mxu0 %v2331_v13  ;;  %v17_v16 = vlaneseq  ;;  %vm139_vm4 = vcmask 523264   ;;  %s2336_s7 = smov 127   ;;  %s2337_s8 = smov 111  }
   0x2   :  { %v2082_v4 = vpack.i.bf16 %v75_v1, %v72_v0  ;;  %v73_v5 = vld [vmem:[%s3057_s0 + $0x18] sm:$0xff]  ;;  %v71_v6 = vld [vmem:[%s3057_s0 + $0x8] sm:$0xff]  ;;  %v74_v7 = vld [vmem:[%s3057_s0 + $0x20] sm:$0xff]  ;;  %v1912_v8 = vpack.c.bf16 %v75_v1, %v72_v0  ;;  %1808 = vmatprep.mubr.msk.f32.mxu1 %vm3062_vm0, %v2331_v13  ;;  %s2333_s0 = smov 19   ;;  %2117 = vset.pattern.permute.xlu1 %v2334_v14  ;;  %s2338_s9 = smov 110  }
   0x3   :  { %v2072_v9 = vpack.i.bf16 %v73_v5, %v70_v2  ;;  %v1895_v10 = vpack.c.bf16 %v74_v7, %v71_v6  ;;  %v2077_v11 = vpack.i.bf16 %v74_v7, %v71_v6  ;;  %v1897_v12 = vpack.c.bf16 %v73_v5, %v70_v2  ;;  %v2424_v15 = vld [vmem:[%s3058_s3] sm:$0xff]  ;;  %s2340_s10 = smov 109   ;;  %s2342_s13 = smov 2  }
   0x4   :  { %2083 = vrot.lane.b32.xlu1 %v2082_v4, %s2329_s27  ;;  %1913 = vmatpush3.bf16.msra.mxu1 %v1912_v8  ;;  %v2428_v18 = vand.u32 127, %v17_v16  ;;  %s2343_s14 = smov 126   ;;  %s2345_s15 = smov 3  }
   0x5   :  { %2073 = vrot.lane.b32.xlu0 %v2072_v9, %s2329_s27  ;;  %1914 = vmatprep.subr.bf16.mxu1 %v2328_v3  ;;  %s2349_s18 = smov 5   ;;  %s2350_s21 = smov 123  }
   0x6   :  { %1896 = vmatprep.subr.bf16.mxu0 %v1895_v10  ;;  %vm3064_vm1 = vcmp.lt.s32.totalorder %v2428_v18, 1  ;;  %vm3066_vm2 = vcmp.lt.s32.totalorder %v2428_v18, 18  ;;  %vm3065_vm3 = vcmp.lt.s32.totalorder %v2428_v18, 19  ;;  %v20_v10 = vadd.s32 256, %v2428_v18  ;;  %s2352_s22 = smov 6   ;;  %s2355_s25 = smov 8  }
   0x7   :  { %1898 = vmatpush1.bf16.msra.mxu0 %v1897_v12  ;;  %v19_v12 = vadd.s32 128, %v2428_v18  ;;  %v21_v14 = vcvt.s32.f32 %v2428_v18  ;;  %s2356_s26 = smov 120   ;;  %s2358_s29 = smov 9  }
   0x8   :  { %2088 = vrot.lane.b32.xlu1 %v2072_v9, %s2330_s28  ;;  %s2362_s5 = smov 117   ;;  %s2364_s6 = smov 12  }
   0x9   :  { %2078 = vrot.lane.b32.xlu0 %v2077_v11, %s2329_s27 }
   0xc   :  { %2098 = vrot.lane.b32.xlu1 %v2082_v4, %s2330_s28 }
   0xd   :  { %2093 = vrot.lane.b32.xlu0 %v2077_v11, %s2330_s28 }
  0x10   :  { %2108 = vrot.lane.b32.xlu1 %v2077_v11, %s2333_s0  ;;  %v23_v11 = vcvt.s32.f32 %v20_v10 }
  0x11   :  { %2103 = vrot.lane.b32.xlu0 %v2072_v9, %s2333_s0  ;;  %v133_v9 = vld [vmem:[%s3059_s1] sm:$0xff]  ;;  %s2335_s1 = smov 17  }
  0x12   :  { %v26_v16 = vmul.f32 2.0, %v23_v11 }
  0x14   :  { %136 = vperm.xlu1 %2117, %v2424_v15  }
  0x15   :  { %2113 = vrot.lane.b32.xlu0 %v2082_v4, %s2333_s0 }
  0x76   :  { %v2084_v17 = vpop.permute.xlu1 %2083 }
  0x77   :  { %v2074_v19 = vpop.permute.xlu0 %2073  ;;  %v2086_v20 = vunpack.i.h.bf16 %v2084_v17  ;;  %v2085_v21 = vunpack.i.l.bf16 %v2084_v17  ;;  %v22_v17 = vcvt.s32.f32 %v19_v12 }
  0x78   :  { %v2076_v22 = vunpack.i.h.bf16 %v2074_v19  ;;  %v2075_v23 = vunpack.i.l.bf16 %v2074_v19  ;;  %v24_v19 = vmul.f32 2.0, %v21_v14 }
  0x7a   :  { %v2089_v24 = vpop.permute.xlu1 %2088  ;;  %v93_v30 = vsel %vm3064_vm1, %v2085_v21, %v2075_v23  ;;  %v94_v31 = vsel %vm3064_vm1, %v2086_v20, %v2076_v22 }
  0x7b   :  { %v2079_v25 = vpop.permute.xlu0 %2078  ;;  %v2091_v28 = vunpack.i.h.bf16 %v2089_v24  ;;  %v2090_v29 = vunpack.i.l.bf16 %v2089_v24  ;;  %v1901_v44 = vpack.c.bf16 %v94_v31, %v93_v30 }
  0x7c   :  { %v2081_v26 = vunpack.i.h.bf16 %v2079_v25  ;;  %v2080_v27 = vunpack.i.l.bf16 %v2079_v25 }
  0x7e   :  { %v2099_v32 = vpop.permute.xlu1 %2098  ;;  %v91_v33 = vsel %vm3064_vm1, %v2075_v23, %v2080_v27  ;;  %v92_v34 = vsel %vm3064_vm1, %v2076_v22, %v2081_v26  ;;  %v89_v35 = vsel %vm3064_vm1, %v2080_v27, %v2085_v21  ;;  %v90_v36 = vsel %vm3064_vm1, %v2081_v26, %v2086_v20 }
  0x7f   :  { %v2101_v37 = vunpack.i.h.bf16 %v2099_v32  ;;  %v2100_v38 = vunpack.i.l.bf16 %v2099_v32  ;;  %v2094_v39 = vpop.permute.xlu0 %2093  ;;  %v1899_v40 = vpack.c.bf16 %v92_v34, %v91_v33  ;;  %v1915_v41 = vpack.c.bf16 %v90_v36, %v89_v35 }
  0x80   :  { %v2096_v42 = vunpack.i.h.bf16 %v2094_v39  ;;  %v2095_v43 = vunpack.i.l.bf16 %v2094_v39  ;;  %v29_v20 = vadd.f32 1.0, %v26_v16  ;;  %v25_v21 = vmul.f32 2.0, %v22_v17 }
  0x81   :  { %1900 = vmatprep.subr.bf16.mxu0 %v1899_v40  ;;  %1916 = vmatpush3.bf16.msra.mxu1 %v1915_v41  ;;  %v112_v45 = vsel %vm3066_vm2, %v2100_v38, %v2090_v29  ;;  %v113_v46 = vsel %vm3066_vm2, %v2101_v37, %v2091_v28  ;;  %v27_v22 = vadd.f32 1.0, %v24_v19 }
  0x82   :  { %1902 = vmatpush1.bf16.msra.mxu0 %v1901_v44  ;;  %v2109_v47 = vpop.permute.xlu1 %2108  ;;  %1917 = vmatprep.subr.bf16.mxu1 %v2328_v3  ;;  %v110_v48 = vsel %vm3066_vm2, %v2090_v29, %v2095_v43  ;;  %v111_v49 = vsel %vm3066_vm2, %v2091_v28, %v2096_v42  ;;  %v108_v50 = vsel %vm3066_vm2, %v2095_v43, %v2100_v38  ;;  %v32_v23 = vmul.f32 0.027777778, %v29_v20 }
  0x83   :  { %v2111_v51 = vunpack.i.h.bf16 %v2109_v47  ;;  %v2110_v52 = vunpack.i.l.bf16 %v2109_v47  ;;  %v2104_v53 = vpop.permute.xlu0 %2103  ;;  %v1903_v54 = vpack.c.bf16 %v111_v49, %v110_v48  ;;  %v109_v55 = vsel %vm3066_vm2, %v2096_v42, %v2101_v37 }
  0x84   :  { %v2106_v56 = vunpack.i.h.bf16 %v2104_v53  ;;  %v2105_v57 = vunpack.i.l.bf16 %v2104_v53  ;;  %v1918_v58 = vpack.c.bf16 %v109_v55, %v108_v50  ;;  %v1905_v59 = vpack.c.bf16 %v113_v46, %v112_v45 }
  0x85   :  { %1904 = vmatprep.subr.bf16.mxu0 %v1903_v54  ;;  %v28_v24 = vadd.f32 1.0, %v25_v21  ;;  %v30_v25 = vmul.f32 0.027777778, %v27_v22  ;;  %v35_v26 = vfloor.f32 %v32_v23 }
  0x86   :  { %1919 = vmatpush3.bf16.msra.mxu1 %v1918_v58  ;;  %1906 = vmatpush1.bf16.msra.mxu0 %v1905_v59  ;;  %v129_v60 = vsel %vm3065_vm3, %v2105_v57, %v2110_v52  ;;  %v130_v61 = vsel %vm3065_vm3, %v2106_v56, %v2111_v51 }
  0x87   :  { %v2114_v62 = vpop.permute.xlu0 %2113  ;;  %v1907_v63 = vpack.c.bf16 %v130_v61, %v129_v60  ;;  %1920 = vmatprep.subr.bf16.mxu1 %v2328_v3  ;;  %v31_v27 = vmul.f32 0.027777778, %v28_v24  ;;  %v33_v28 = vfloor.f32 %v30_v25  ;;  %v38_v29 = vmul.f32 18.0, %v35_v26 }
  0x88   :  { %v2116_v0 = vunpack.i.h.bf16 %v2114_v62  ;;  %v2115_v1 = vunpack.i.l.bf16 %v2114_v62  ;;  %vm44_vm5 = vcmp.ge.f32.partialorder %v35_v26, 1.0  ;;  %vm47_vm6 = vcmp.le.f32.partialorder %v35_v26, 16.0 }
  0x89   :  { %1908 = vmatprep.subr.bf16.mxu0 %v1907_v63  ;;  %v34_v30 = vfloor.f32 %v31_v27  ;;  %v36_v31 = vmul.f32 18.0, %v33_v28  ;;  %v41_v32 = vsub.f32 %v23_v11, %v38_v29  ;;  %vm42_vm7 = vcmp.ge.f32.partialorder %v33_v28, 1.0  ;;  %vm50_vm9 = vmand %vm44_vm5, %vm47_vm6 }
  0x8a   :  { %v131_v2 = vsel %vm3065_vm3, %v2115_v1, %v2105_v57  ;;  %v132_v4 = vsel %vm3065_vm3, %v2116_v0, %v2106_v56  ;;  %v127_v5 = vsel %vm3065_vm3, %v2110_v52, %v2115_v1  ;;  %v128_v6 = vsel %vm3065_vm3, %v2111_v51, %v2116_v0 }
  0x8b   :  { %v1909_v7 = vpack.c.bf16 %v132_v4, %v131_v2  ;;  %v1921_v8 = vpack.c.bf16 %v128_v6, %v127_v5  ;;  %v37_v33 = vmul.f32 18.0, %v34_v30  ;;  %v39_v34 = vsub.f32 %v21_v14, %v36_v31 }
  0x8c   :  { %vm45_vm8 = vcmp.le.f32.partialorder %v33_v28, 16.0  ;;  %vm53_vm10 = vcmp.ge.f32.partialorder %v41_v32, 1.0  ;;  %vm43_vm11 = vcmp.ge.f32.partialorder %v34_v30, 1.0  ;;  %vm46_vm12 = vcmp.le.f32.partialorder %v34_v30, 16.0 }
  0x8d   :  { %1910 = vmatpush1.bf16.msra.mxu0 %v1909_v7  ;;  %1922 = vmatpush3.bf16.msra.mxu1 %v1921_v8  ;;  %v40_v35 = vsub.f32 %v22_v17, %v37_v33  ;;  %vm48_vm13 = vmand %vm42_vm7, %vm45_vm8  ;;  %vm51_vm14 = vcmp.ge.f32.partialorder %v39_v34, 1.0  ;;  %vm57_vm2 = vcmp.le.f32.partialorder %v39_v34, 16.0  ;;  %v2339_v52 = vmov 1  }
  0x8e   :  { %1939 = vmatprep.subr.bf16.mxu1 %v2328_v3  ;;  %vm56_vm15 = vmand %vm50_vm9, %vm53_vm10  ;;  %2153 = vset.pattern.permute.xlu1 %v2339_v52 }
  0x8f   :  { %vm52_vm1 = vcmp.ge.f32.partialorder %v40_v35, 1.0  ;;  %vm54_vm3 = vmand %vm48_vm13, %vm51_vm14  ;;  %vm58_vm7 = vcmp.le.f32.partialorder %v40_v35, 16.0  ;;  %vm3073_vm13 = vcmp.lt.s32.totalorder %v2428_v18, 1 }
  0x90   :  { %1730 = vmatmul.mubr.msk.f32.vlgmr.msra.gmra.mrb[0].mxu0 %vm139_vm4, %v133_v9  ;;  %1809 = vmatmul.mubr.msk.f32.vlgmr.msra.gmra.mrb[0].mxu1 %vm139_vm4, %v133_v9  ;;  %vm59_vm4 = vcmp.le.f32.partialorder %v41_v32, 16.0  ;;  %vm60_vm8 = vmand %vm54_vm3, %vm57_vm2  ;;  %vm3069_vm3 = vcmp.lt.s32.totalorder %v2428_v18, 19 }
  0x91   :  { %1829 = vmatprep.mubr.msk.f32.mxu1 %vm3062_vm0, %v2331_v13  ;;  %437 = vmatprep.mubr.f32.mxu0 %v2331_v13  ;;  %vm49_vm0 = vmand %vm43_vm11, %vm46_vm12  ;;  %v2488_v46 = vsel %vm60_vm8, 1.0, %v2331_v13  ;;  %vm369_vm8 = vcmask 588800  }
  0x92   :  { %vm62_vm5 = vmand %vm56_vm15, %vm59_vm4  ;;  %vm330_vm4 = vcmp.lt.s32.totalorder %v2428_v18, 127 }
  0x93   :  { %v137_v36 = vpop.permute.xlu1 %136  ;;  %vm55_vm6 = vmand %vm49_vm0, %vm52_vm1  ;;  %v2482_v38 = vsel %vm62_vm5, 1.0, %v2331_v13  ;;  %vm311_vm0 = vcmp.lt.s32.totalorder %v2428_v18, 17  ;;  %vm3067_vm1 = vcmp.lt.s32.totalorder %v2428_v18, 18  ;;  %vm350_vm5 = vcmp.lt.s32.totalorder %v2428_v18, 110 }
  0x94   :  { %vm61_vm9 = vmand %vm55_vm6, %vm58_vm7  ;;  %vm340_vm6 = vcmp.lt.s32.totalorder %v2428_v18, 111  ;;  %vm360_vm7 = vcmp.lt.s32.totalorder %v2428_v18, 109 }
  0x95   :  { %v2491_v47 = vsel %vm61_vm9, 1.0, %v2331_v13  ;;  %vm3068_vm2 = vmmov %vm3067_vm1  ;;  %vm3076_vm9 = vmmov 0  }
  0x96   :  { %vm3070_vm10 = vmmov %vm3069_vm3 }
  0x97   :  { %vm3071_vm11 = vmmov %vm3069_vm3 }
  0x98   :  { %vm3072_vm12 = vmmov %vm3067_vm1 }
  0x99   :  { %vm3074_vm14 = vmmov %vm3073_vm13 }
  0x9a   :  { %vm3075_vm15 = vmmov %vm3073_vm13 }
 0x163   :  { %v209_v37 = vpop.f32.mrb[0].mxu0  ;;  %v280_v39 = vpop.f32.mrb[0].mxu1 }
 0x164   :  { %v281_v40 = vadd.f32 %v280_v39, %v137_v36  ;;  %v211_v41 = vpop.f32.mrb[1].mxu0  ;;  %v1810_v42 = vpop.f32.mrb[1].mxu1  ;;  %v210_v43 = vadd.f32 %v209_v37, %v137_v36 }
 0x165   :  { %v212_v45 = vadd.f32 %v211_v41, %v137_v36 }
 0x166   :  { %v2485_v44 = vmul.f32 %v2482_v38, %v281_v40  ;;  %v2498_v48 = vmul.f32 %v2488_v46, %v210_v43 }
 0x167   :  { %v2501_v49 = vmul.f32 %v2491_v47, %v212_v45 }
 0x168   :  { %300 = vrot.lane.b32.xlu1 %v2485_v44, %s2330_s28  ;;  %291 = vrot.lane.b32.xlu0 %v2485_v44, %s2333_s0 }
 0x169   :  { %v2123_v50 = vpack.i.bf16 %v2501_v49, %v2498_v48  ;;  %v2148_v51 = vpack.i.bf16 %v2485_v44, %v2501_v49 }
 0x16c   :  { %319 = vrot.lane.b32.xlu1 %v2485_v44, %s2329_s27  ;;  %309 = vrot.lane.b32.xlu0 %v2485_v44, %s2335_s1 }
 0x170   :  { %2124 = vrot.lane.b32.xlu1 %v2123_v50, %s2330_s28  ;;  %2119 = vrot.lane.b32.xlu0 %v2123_v50, %s2333_s0 }
 0x174   :  { %2134 = vrot.lane.b32.xlu1 %v2123_v50, %s2329_s27  ;;  %2129 = vrot.lane.b32.xlu0 %v2123_v50, %s2335_s1 }
 0x178   :  { %324 = vrot.lane.b32.xlu1 %v2498_v48, %s2336_s7  ;;  %334 = vrot.lane.b32.xlu0 %v2498_v48, %s2337_s8 }
 0x17c   :  { %2149 = vrot.lane.b32.xlu1 %v2148_v51, %s2338_s9  ;;  %2139 = vrot.lane.b32.xlu0 %v2148_v51, %s2336_s7 }
 0x180   :  { %344 = vrot.lane.b32.xlu1 %v2498_v48, %s2338_s9  ;;  %2144 = vrot.lane.b32.xlu0 %v2148_v51, %s2337_s8 }
 0x184   :  { %358 = vrot.lane.b32.xlu1 %v2485_v44, %s2340_s10  ;;  %356 = vrot.lane.b32.xlu0 %v2501_v49, %s2340_s10 }
 0x188   :  { %354 = vrot.lane.b32.xlu0 %v2498_v48, %s2340_s10  ;;  %366 = vperm.xlu1 %2153, %v2424_v15  }
 0x1da   :  { %v301_v53 = vpop.permute.xlu1 %300  ;;  %v292_v54 = vpop.permute.xlu0 %291 }
 0x1de   :  { %v320_v55 = vpop.permute.xlu1 %319  ;;  %v310_v56 = vpop.permute.xlu0 %309 }
 0x1e2   :  { %v2125_v57 = vpop.permute.xlu1 %2124  ;;  %v2120_v58 = vpop.permute.xlu0 %2119 }
 0x1e3   :  { %v2127_v59 = vunpack.i.h.bf16 %v2125_v57  ;;  %v2126_v60 = vunpack.i.l.bf16 %v2125_v57  ;;  %v2122_v61 = vunpack.i.h.bf16 %v2120_v58  ;;  %v2121_v62 = vunpack.i.l.bf16 %v2120_v58 }
 0x1e5   :  { %v302_v63 = vsel %vm3067_vm1, %v2127_v59, %v301_v53  ;;  %v304_v0 = vsel %vm3068_vm2, %v301_v53, %v2126_v60  ;;  %v293_v1 = vsel %vm3069_vm3, %v2122_v61, %v292_v54  ;;  %v295_v2 = vsel %vm3070_vm10, %v292_v54, %v2121_v62 }
 0x1e6   :  { %v1940_v4 = vpack.c.bf16 %v302_v63, %v293_v1  ;;  %v1925_v5 = vpack.c.bf16 %v304_v0, %v295_v2  ;;  %v2135_v6 = vpop.permute.xlu1 %2134  ;;  %v2130_v7 = vpop.permute.xlu0 %2129  ;;  %v294_v8 = vsel %vm3071_vm11, %v2121_v62, %v2122_v61  ;;  %v303_v9 = vsel %vm3072_vm12, %v2126_v60, %v2127_v59  ;;  %v364_v61 = vld [vmem:[%s3060_s2] sm:$0xff]  ;;  %vm3077_vm11 = vmmov %vm3072_vm12 }
 0x1e7   :  { %v2137_v10 = vunpack.i.h.bf16 %v2135_v6  ;;  %v2136_v11 = vunpack.i.l.bf16 %v2135_v6  ;;  %v2132_v12 = vunpack.i.h.bf16 %v2130_v7  ;;  %v2131_v14 = vunpack.i.l.bf16 %v2130_v7  ;;  %vm3078_vm12 = vmmov %vm3070_vm10 }
 0x1e8   :  { %v1923_v16 = vpack.c.bf16 %v303_v9, %v294_v8  ;;  %1941 = vmatpush3.bf16.msra.mxu1 %v1940_v4 }
 0x1e9   :  { %v321_v17 = vsel %vm3073_vm13, %v2137_v10, %v320_v55  ;;  %v323_v19 = vsel %vm3074_vm14, %v320_v55, %v2136_v11  ;;  %v312_v20 = vsel %vm311_vm0, %v2132_v12, %v310_v56  ;;  %v314_v21 = vsel %vm311_vm0, %v310_v56, %v2131_v14  ;;  %1942 = vmatprep.subr.bf16.mxu1 %v2328_v3  ;;  %vm3079_vm13 = vmmov %vm3070_vm10 }
 0x1ea   :  { %v1943_v22 = vpack.c.bf16 %v321_v17, %v312_v20  ;;  %1924 = vmatprep.subr.bf16.mxu0 %v1923_v16  ;;  %v325_v23 = vpop.permute.xlu1 %324  ;;  %v335_v24 = vpop.permute.xlu0 %334  ;;  %v313_v25 = vsel %vm311_vm0, %v2131_v14, %v2132_v12  ;;  %v322_v26 = vsel %vm3075_vm15, %v2136_v11, %v2137_v10  ;;  %v1929_v27 = vpack.c.bf16 %v323_v19, %v314_v21  ;;  %vm3080_vm14 = vmmov %vm3077_vm11 }
 0x1eb   :  { %1926 = vmatpush1.bf16.msra.mxu0 %v1925_v5  ;;  %v1927_v28 = vpack.c.bf16 %v322_v26, %v313_v25  ;;  %vm3081_vm15 = vmmov %vm3077_vm11 }
 0x1ec   :  { %1944 = vmatpush3.bf16.msra.mxu1 %v1943_v22 }
 0x1ed   :  { %1928 = vmatprep.subr.bf16.mxu0 %v1927_v28  ;;  %1945 = vmatprep.subr.bf16.mxu1 %v2328_v3 }
 0x1ee   :  { %v2150_v29 = vpop.permute.xlu1 %2149  ;;  %v2140_v30 = vpop.permute.xlu0 %2139 }
 0x1ef   :  { %1930 = vmatpush1.bf16.msra.mxu0 %v1929_v27  ;;  %v2142_v31 = vunpack.i.h.bf16 %v2140_v30  ;;  %v2141_v32 = vunpack.i.l.bf16 %v2140_v30  ;;  %v2152_v33 = vunpack.i.h.bf16 %v2150_v29  ;;  %v2151_v34 = vunpack.i.l.bf16 %v2150_v29 }
 0x1f1   :  { %v333_v35 = vsel %vm330_vm4, %v2142_v31, %v325_v23  ;;  %v332_v36 = vsel %vm330_vm4, %v325_v23, %v2141_v32  ;;  %v331_v37 = vsel %vm330_vm4, %v2141_v32, %v2142_v31 }
 0x1f2   :  { %v1946_v39 = vpack.c.bf16 %v333_v35, %v2485_v44  ;;  %v1933_v40 = vpack.c.bf16 %v332_v36, %v2498_v48  ;;  %v345_v41 = vpop.permute.xlu1 %344  ;;  %v2145_v42 = vpop.permute.xlu0 %2144  ;;  %v1931_v43 = vpack.c.bf16 %v331_v37, %v2501_v49  ;;  %v351_v44 = vsel %vm350_vm5, %v2151_v34, %v2152_v33 }
 0x1f3   :  { %v2147_v45 = vunpack.i.h.bf16 %v2145_v42  ;;  %v2146_v50 = vunpack.i.l.bf16 %v2145_v42  ;;  %v352_v51 = vsel %vm350_vm5, %v345_v41, %v2151_v34  ;;  %v353_v52 = vsel %vm350_vm5, %v2152_v33, %v345_v41 }
 0x1f4   :  { %1932 = vmatprep.subr.bf16.mxu0 %v1931_v43  ;;  %1947 = vmatpush3.bf16.msra.mxu1 %v1946_v39  ;;  %v2341_v33 = vmov 2   ;;  %v2344_v37 = vmov 3  }
 0x1f5   :  { %v343_v48 = vsel %vm340_vm6, %v2147_v45, %v335_v24  ;;  %v342_v53 = vsel %vm340_vm6, %v335_v24, %v2146_v50  ;;  %1934 = vmatpush1.bf16.msra.mxu0 %v1933_v40  ;;  %1948 = vmatprep.subr.bf16.mxu1 %v2328_v3  ;;  %v341_v49 = vsel %vm340_vm6, %v2146_v50, %v2147_v45 }
 0x1f6   :  { %v1949_v54 = vpack.c.bf16 %v353_v52, %v343_v48  ;;  %v1937_v55 = vpack.c.bf16 %v352_v51, %v342_v53  ;;  %v359_v56 = vpop.permute.xlu1 %358  ;;  %v357_v57 = vpop.permute.xlu0 %356  ;;  %v1935_v58 = vpack.c.bf16 %v351_v44, %v341_v49  ;;  %2154 = vset.pattern.permute.xlu1 %v2341_v33  ;;  %2155 = vset.pattern.permute.xlu0 %v2344_v37 }
 0x1f7   :  { %v361_v59 = vsel %vm360_vm7, %v357_v57, %v359_v56 }
 0x1f8   :  { %1936 = vmatprep.subr.bf16.mxu0 %v1935_v58  ;;  %1950 = vmatpush3.bf16.msra.mxu1 %v1949_v54 }
 0x1f9   :  { %1938 = vmatpush1.bf16.msra.mxu0 %v1937_v55  ;;  %1827 = vmatprep.subr.mxu1 %v2331_v13 }
 0x1fa   :  { %v355_v60 = vpop.permute.xlu0 %354  ;;  %389 = vmatprep.subr.mxu0 %v361_v59 }
 0x1fb   :  { %v362_v62 = vsel %vm360_vm7, %v355_v60, %v357_v57  ;;  %v363_v63 = vsel %vm360_vm7, %v359_v56, %v355_v60 }
 0x1fc   :  { %1828 = vmatpush3.msra.mxu1 %v363_v63 }
 0x1fd   :  { %390 = vmatpush1.msra.mxu0 %v362_v62  ;;  %1830 = vmatmul.mubr.msk.f32.vlgmr.msra.gmra.mrb[2].mxu1 %vm369_vm8, %v364_v61 }
 0x1fe   :  { %1732 = vmatmul.mubr.msk.f32.vlgmr.msra.gmra.mrb[2].mxu0 %vm369_vm8, %v364_v61  ;;  %1967 = vmatprep.subr.bf16.mxu1 %v2328_v3 }
 0x1ff   :  { %794 = vmatprep.mubr.f32.mxu0 %v2331_v13  ;;  %1850 = vmatprep.mubr.msk.f32.mxu1 %vm3076_vm9, %v2331_v13 }
 0x207   :  { %v367_v0 = vpop.permute.xlu1 %366 }
 0x2d0   :  { %v510_v1 = vpop.f32.mrb[2].mxu1 }
 0x2d1   :  { %v511_v2 = vadd.f32 %v510_v1, %v367_v0  ;;  %v439_v4 = vpop.f32.mrb[2].mxu0  ;;  %v1831_v5 = vpop.f32.mrb[3].mxu1 }
 0x2d2   :  { %v440_v6 = vadd.f32 %v439_v4, %v367_v0  ;;  %v441_v7 = vpop.f32.mrb[3].mxu0 }
 0x2d3   :  { %v442_v8 = vadd.f32 %v441_v7, %v367_v0  ;;  %v516_v11 = vmul.f32 %v2482_v38, %v511_v2 }
 0x2d4   :  { %v514_v9 = vmul.f32 %v2488_v46, %v440_v6 }
 0x2d5   :  { %v515_v10 = vmul.f32 %v2491_v47, %v442_v8  ;;  %v523_v19 = vmul.f32 %v516_v11, %v511_v2 }
 0x2d6   :  { %v521_v12 = vmul.f32 %v514_v9, %v440_v6 }
 0x2d7   :  { %v522_v14 = vmul.f32 %v515_v10, %v442_v8  ;;  %v517_v16 = vadd.f32 %v515_v10, %v514_v9 }
 0x2d9   :  { %v518_v17 = vadd.f32 %v517_v16, %v516_v11  ;;  %v524_v20 = vadd.f32 %v522_v14, %v521_v12 }
 0x2db   :  { %519 = vadd.xlane.f32.xlu0 %v518_v17  ;;  %v525_v21 = vadd.f32 %v524_v20, %v523_v19 }
 0x2dd   :  { %526 = vadd.xlane.f32.xlu1 %v525_v21 }
 0x368   :  { %v520_v22 = vpop.xlane.xlu0 %519 }
 0x369   :  { %v528_v23 = vrot.slane %v520_v22, 4 }
 0x36a   :  { %v527_v24 = vpop.xlane.xlu1 %526 }
 0x36b   :  { %v529_v25 = vadd.f32 %v528_v23, %v520_v22  ;;  %v530_v26 = vrot.slane %v527_v24, 4 }
 0x36d   :  { %v532_v27 = vmul.f32 0.001953125, %v529_v25  ;;  %v531_v28 = vadd.f32 %v530_v26, %v527_v24 }
 0x36f   :  { %v534_v29 = vmul.f32 %v532_v27, %v532_v27  ;;  %v533_v30 = vmul.f32 0.001953125, %v531_v28 }
 0x371   :  { %v535_v31 = vsub.f32 %v533_v30, %v534_v29 }
 0x373   :  { %v536_v32 = vadd.f32 1e-05, %v535_v31 }
 0x375   :  { %2270 = vrsqrt.f32 %v536_v32 }
 0x37f   :  { %v2271_v34 = vpop.eup %2270 }
 0x380   :  { %539 = vrot.lane.b32.xlu0 %v2271_v34, %s2342_s13 }
 0x3f2   :  { %v540_v35 = vpop.permute.xlu0 %539 }
 0x3f3   :  { %v542_v36 = vmul.f32 %v540_v35, %v2424_v15 }
 0x3f5   :  { %544 = vrot.lane.b32.xlu1 %v542_v36, %s2343_s14 }
 0x3f9   :  { %554 = vperm.xlu1 %2154, %v542_v36  }
 0x467   :  { %v545_v39 = vpop.permute.xlu1 %544 }
 0x468   :  { %v547_v40 = vmul.f32 %v545_v39, %v532_v27 }
 0x46a   :  { %549 = vrot.lane.b32.xlu0 %v547_v40, %s2345_s15 }
 0x478   :  { %v555_v43 = vpop.permute.xlu1 %554 }
 0x479   :  { %v557_v45 = vmul.f32 %v555_v43, %v440_v6  ;;  %v558_v50 = vmul.f32 %v555_v43, %v442_v8  ;;  %v559_v51 = vmul.f32 %v555_v43, %v511_v2 }
 0x4dc   :  { %v550_v41 = vpop.permute.xlu0 %549 }
 0x4dd   :  { %v552_v42 = vsub.f32 %v2424_v15, %v550_v41 }
 0x4df   :  { %562 = vperm.xlu0 %2155, %v552_v42  }
 0x55e   :  { %v563_v52 = vpop.permute.xlu0 %562 }
 0x55f   :  { %v2605_v44 = vadd.f32 %v563_v52, %v557_v45  ;;  %v2607_v48 = vadd.f32 %v563_v52, %v558_v50  ;;  %v2609_v53 = vadd.f32 %v563_v52, %v559_v51 }
 0x561   :  { %v2612_v49 = vmul.f32 0.70710677, %v2605_v44  ;;  %v2615_v54 = vmul.f32 0.70710677, %v2607_v48  ;;  %v2618_v55 = vmul.f32 0.70710677, %v2609_v53 }
 0x563   :  { %v580_v56 = vand.u32 2147483647, %v2612_v49  ;;  %v581_v57 = vand.u32 2147483647, %v2615_v54  ;;  %v582_v58 = vand.u32 2147483647, %v2618_v55 }
 0x564   :  { %vm574_vm1 = vcmp.lt.f32.partialorder %v2612_v49, 0.0  ;;  %vm575_vm2 = vcmp.lt.f32.partialorder %v2615_v54, 0.0  ;;  %vm576_vm3 = vcmp.lt.f32.partialorder %v2618_v55, 0.0 }
 0x565   :  { %v583_v59 = vmul.f32 0.3275911, %v580_v56  ;;  %v584_v60 = vmul.f32 0.3275911, %v581_v57  ;;  %v585_v61 = vmul.f32 0.3275911, %v582_v58 }
 0x566   :  { %v619_v1 = vsub.f32 0.0, %v580_v56  ;;  %v620_v2 = vsub.f32 0.0, %v581_v57  ;;  %v621_v4 = vsub.f32 0.0, %v582_v58 }
 0x567   :  { %v586_v62 = vadd.f32 1.0, %v583_v59  ;;  %v587_v63 = vadd.f32 1.0, %v584_v60  ;;  %v588_v0 = vadd.f32 1.0, %v585_v61  ;;  %v2346_v60 = vmov 1.0  }
 0x568   :  { %v622_v6 = vmul.f32 %v619_v1, %v580_v56  ;;  %v623_v9 = vmul.f32 %v620_v2, %v581_v57  ;;  %v624_v12 = vmul.f32 %v621_v4, %v582_v58  ;;  %v577_v61 = vsel %vm574_vm1, -1.0, %v2346_v60 }
 0x569   :  { %2272 = vrcp.f32 %v586_v62  ;;  %v579_v49 = vsel %vm576_vm3, -1.0, %v2346_v60  ;;  %v568_v4 = vmul.f32 0.5, %v2605_v44  ;;  %vm3082_vm1 = vcmp.lt.s32.totalorder %v2428_v18, 1 }
 0x56a   :  { %2274 = vrcp.f32 %v587_v63  ;;  %v625_v19 = vmul.f32 1.442695, %v622_v6  ;;  %v627_v22 = vmul.f32 1.442695, %v623_v9  ;;  %v629_v24 = vmul.f32 1.442695, %v624_v12  ;;  %vm3084_vm3 = vmmov %vm3082_vm1 }
 0x56b   :  { %2276 = vrcp.f32 %v588_v0  ;;  %v578_v63 = vsel %vm575_vm2, -1.0, %v2346_v60  ;;  %v569_v6 = vmul.f32 0.5, %v2607_v48  ;;  %vm3083_vm2 = vmmov %vm3082_vm1 }
 0x56c   :  { %2278 = vpow2.f32 %v625_v19 }
 0x56d   :  { %2280 = vpow2.f32 %v627_v22 }
 0x56e   :  { %2282 = vpow2.f32 %v629_v24 }
 0x573   :  { %v2273_v5 = vpop.eup %2272 }
 0x574   :  { %v2275_v7 = vpop.eup %2274  ;;  %v592_v8 = vmul.f32 1.0614054, %v2273_v5 }
 0x575   :  { %v2277_v10 = vpop.eup %2276  ;;  %v593_v11 = vmul.f32 1.0614054, %v2275_v7 }
 0x576   :  { %v594_v14 = vmul.f32 1.0614054, %v2277_v10  ;;  %v595_v16 = vadd.f32 -1.4531521, %v592_v8  ;;  %v2279_v43 = vpop.eup %2278 }
 0x577   :  { %v596_v17 = vadd.f32 -1.4531521, %v593_v11  ;;  %v2281_v50 = vpop.eup %2280 }
 0x578   :  { %v597_v20 = vadd.f32 -1.4531521, %v594_v14  ;;  %v598_v21 = vmul.f32 %v2273_v5, %v595_v16  ;;  %v2283_v56 = vpop.eup %2282 }
 0x579   :  { %v599_v23 = vmul.f32 %v2275_v7, %v596_v17 }
 0x57a   :  { %v600_v25 = vmul.f32 %v2277_v10, %v597_v20  ;;  %v601_v26 = vadd.f32 1.4214138, %v598_v21 }
 0x57b   :  { %v602_v27 = vadd.f32 1.4214138, %v599_v23 }
 0x57c   :  { %v603_v28 = vadd.f32 1.4214138, %v600_v25  ;;  %v604_v29 = vmul.f32 %v2273_v5, %v601_v26 }
 0x57d   :  { %v605_v30 = vmul.f32 %v2275_v7, %v602_v27 }
 0x57e   :  { %v606_v31 = vmul.f32 %v2277_v10, %v603_v28  ;;  %v607_v32 = vadd.f32 -0.28449672, %v604_v29 }
 0x57f   :  { %v608_v33 = vadd.f32 -0.28449672, %v605_v30 }
 0x580   :  { %v609_v34 = vadd.f32 -0.28449672, %v606_v31  ;;  %v610_v35 = vmul.f32 %v2273_v5, %v607_v32 }
 0x581   :  { %v611_v36 = vmul.f32 %v2275_v7, %v608_v33 }
 0x582   :  { %v612_v37 = vmul.f32 %v2277_v10, %v609_v34  ;;  %v613_v39 = vadd.f32 0.2548296, %v610_v35 }
 0x583   :  { %v614_v40 = vadd.f32 0.2548296, %v611_v36 }
 0x584   :  { %v615_v41 = vadd.f32 0.2548296, %v612_v37  ;;  %v616_v42 = vmul.f32 %v2273_v5, %v613_v39 }
 0x585   :  { %v617_v45 = vmul.f32 %v2275_v7, %v614_v40  ;;  %v570_v7 = vmul.f32 0.5, %v2609_v53  ;;  %v2347_v53 = vmov 4  }
 0x586   :  { %v618_v51 = vmul.f32 %v2277_v10, %v615_v41  ;;  %v631_v52 = vmul.f32 %v2279_v43, %v616_v42  ;;  %2191 = vset.pattern.permute.xlu1 %v2347_v53 }
 0x587   :  { %v632_v57 = vmul.f32 %v2281_v50, %v617_v45 }
 0x588   :  { %v633_v58 = vmul.f32 %v2283_v56, %v618_v51  ;;  %v634_v59 = vsub.f32 1.0, %v631_v52 }
 0x589   :  { %v635_v62 = vsub.f32 1.0, %v632_v57 }
 0x58a   :  { %v636_v0 = vsub.f32 1.0, %v633_v58  ;;  %v637_v1 = vmul.f32 %v634_v59, %v577_v61 }
 0x58b   :  { %v638_v2 = vmul.f32 %v635_v62, %v578_v63 }
 0x58c   :  { %v639_v5 = vmul.f32 %v636_v0, %v579_v49  ;;  %v640_v54 = vadd.f32 1.0, %v637_v1 }
 0x58d   :  { %v641_v55 = vadd.f32 1.0, %v638_v2 }
 0x58e   :  { %v642_v8 = vadd.f32 1.0, %v639_v5  ;;  %v643_v9 = vmul.f32 %v640_v54, %v568_v4 }
 0x58f   :  { %v644_v10 = vmul.f32 %v641_v55, %v569_v6 }
 0x590   :  { %v645_v11 = vmul.f32 %v642_v8, %v570_v7  ;;  %v2633_v12 = vmul.f32 %v2488_v46, %v643_v9 }
 0x591   :  { %v2636_v14 = vmul.f32 %v2491_v47, %v644_v10 }
 0x592   :  { %v2639_v16 = vmul.f32 %v2482_v38, %v645_v11 }
 0x593   :  { %v2156_v44 = vpack.i.bf16 %v2636_v14, %v2633_v12 }
 0x594   :  { %653 = vrot.lane.b32.xlu0 %v2639_v16, %s2333_s0  ;;  %v2176_v48 = vpack.i.bf16 %v2639_v16, %v2636_v14 }
 0x595   :  { %2157 = vrot.lane.b32.xlu1 %v2156_v44, %s2333_s0 }
 0x598   :  { %2167 = vrot.lane.b32.xlu0 %v2156_v44, %s2335_s1 }
 0x599   :  { %2162 = vrot.lane.b32.xlu1 %v2156_v44, %s2330_s28 }
 0x59c   :  { %671 = vrot.lane.b32.xlu0 %v2639_v16, %s2335_s1 }
 0x59d   :  { %662 = vrot.lane.b32.xlu1 %v2639_v16, %s2330_s28 }
 0x5a0   :  { %2177 = vrot.lane.b32.xlu0 %v2176_v48, %s2336_s7 }
 0x5a1   :  { %2172 = vrot.lane.b32.xlu1 %v2156_v44, %s2329_s27 }
 0x5a4   :  { %2182 = vrot.lane.b32.xlu0 %v2176_v48, %s2337_s8 }
 0x5a5   :  { %680 = vrot.lane.b32.xlu1 %v2639_v16, %s2329_s27 }
 0x5a8   :  { %694 = vrot.lane.b32.xlu0 %v2633_v12, %s2337_s8 }
 0x5a9   :  { %685 = vrot.lane.b32.xlu1 %v2633_v12, %s2336_s7 }
 0x5ac   :  { %714 = vrot.lane.b32.xlu0 %v2636_v14, %s2340_s10 }
 0x5ad   :  { %2187 = vrot.lane.b32.xlu1 %v2176_v48, %s2338_s9 }
 0x5b0   :  { %712 = vrot.lane.b32.xlu0 %v2633_v12, %s2340_s10 }
 0x5b1   :  { %703 = vrot.lane.b32.xlu1 %v2633_v12, %s2338_s9 }
 0x5b5   :  { %716 = vrot.lane.b32.xlu1 %v2639_v16, %s2340_s10 }
 0x5b9   :  { %724 = vperm.xlu1 %2191, %v2424_v15  }
 0x606   :  { %v654_v17 = vpop.permute.xlu0 %653 }
 0x607   :  { %v2158_v19 = vpop.permute.xlu1 %2157 }
 0x608   :  { %v2160_v20 = vunpack.i.h.bf16 %v2158_v19  ;;  %v2159_v21 = vunpack.i.l.bf16 %v2158_v19 }
 0x60a   :  { %v2168_v22 = vpop.permute.xlu0 %2167  ;;  %v656_v27 = vsel %vm3070_vm10, %v2159_v21, %v2160_v20  ;;  %v655_v15 = vsel %vm3078_vm12, %v2160_v20, %v654_v17  ;;  %v657_v31 = vsel %vm3079_vm13, %v654_v17, %v2159_v21 }
 0x60b   :  { %v2163_v23 = vpop.permute.xlu1 %2162  ;;  %v2170_v36 = vunpack.i.h.bf16 %v2168_v22  ;;  %v2169_v37 = vunpack.i.l.bf16 %v2168_v22 }
 0x60c   :  { %v2165_v24 = vunpack.i.h.bf16 %v2163_v23  ;;  %v2164_v25 = vunpack.i.l.bf16 %v2163_v23 }
 0x60d   :  { %v674_v51 = vsel %vm311_vm0, %v2169_v37, %v2170_v36 }
 0x60e   :  { %v672_v26 = vpop.permute.xlu0 %671  ;;  %v665_v28 = vsel %vm3077_vm11, %v2164_v25, %v2165_v24 }
 0x60f   :  { %v663_v29 = vpop.permute.xlu1 %662  ;;  %v1951_v30 = vpack.c.bf16 %v665_v28, %v656_v27  ;;  %v673_v59 = vsel %vm311_vm0, %v2170_v36, %v672_v26  ;;  %v675_v61 = vsel %vm311_vm0, %v672_v26, %v2169_v37  ;;  %v1734_v26 = vld [vmem:[%s3060_s2 + $0x8] sm:$0xff] }
 0x610   :  { %v664_v32 = vsel %vm3080_vm14, %v2165_v24, %v663_v29  ;;  %v666_v33 = vsel %vm3081_vm15, %v663_v29, %v2164_v25  ;;  %vm3085_vm15 = vmmov %vm3079_vm13 }
 0x611   :  { %v1953_v34 = vpack.c.bf16 %v666_v33, %v657_v31  ;;  %v1968_v35 = vpack.c.bf16 %v664_v32, %v655_v15  ;;  %1952 = vmatprep.subr.bf16.mxu0 %v1951_v30 }
 0x612   :  { %v2178_v39 = vpop.permute.xlu0 %2177 }
 0x613   :  { %v2180_v40 = vunpack.i.h.bf16 %v2178_v39  ;;  %v2179_v41 = vunpack.i.l.bf16 %v2178_v39  ;;  %v2173_v42 = vpop.permute.xlu1 %2172  ;;  %1954 = vmatpush1.bf16.msra.mxu0 %v1953_v34  ;;  %1969 = vmatpush3.bf16.msra.mxu1 %v1968_v35 }
 0x614   :  { %v2175_v43 = vunpack.i.h.bf16 %v2173_v42  ;;  %v2174_v45 = vunpack.i.l.bf16 %v2173_v42  ;;  %1970 = vmatprep.subr.bf16.mxu1 %v2328_v3 }
 0x615   :  { %v691_v58 = vsel %vm330_vm4, %v2179_v41, %v2180_v40 }
 0x616   :  { %v2183_v50 = vpop.permute.xlu0 %2182  ;;  %v683_v52 = vsel %vm3082_vm1, %v2174_v45, %v2175_v43  ;;  %v1959_v49 = vpack.c.bf16 %v691_v58, %v2636_v14  ;;  %vm3086_vm1 = vmmov %vm3079_vm13 }
 0x617   :  { %v681_v56 = vpop.permute.xlu1 %680  ;;  %v1955_v57 = vpack.c.bf16 %v683_v52, %v674_v51  ;;  %v2185_v7 = vunpack.i.h.bf16 %v2183_v50  ;;  %v2184_v8 = vunpack.i.l.bf16 %v2183_v50 }
 0x618   :  { %v682_v62 = vsel %vm3083_vm2, %v2175_v43, %v681_v56  ;;  %v684_v63 = vsel %vm3084_vm3, %v681_v56, %v2174_v45  ;;  %vm3087_vm2 = vmmov %vm3080_vm14 }
 0x619   :  { %v1957_v0 = vpack.c.bf16 %v684_v63, %v675_v61  ;;  %v1971_v1 = vpack.c.bf16 %v682_v62, %v673_v59  ;;  %1956 = vmatprep.subr.bf16.mxu0 %v1955_v57  ;;  %v700_v44 = vsel %vm340_vm6, %v2184_v8, %v2185_v7  ;;  %vm3088_vm3 = vmmov %vm3087_vm2 }
 0x61a   :  { %v695_v2 = vpop.permute.xlu0 %694 }
 0x61b   :  { %v686_v4 = vpop.permute.xlu1 %685  ;;  %1958 = vmatpush1.bf16.msra.mxu0 %v1957_v0  ;;  %1972 = vmatpush3.bf16.msra.mxu1 %v1971_v1  ;;  %v702_v17 = vsel %vm340_vm6, %v2185_v7, %v695_v2 }
 0x61c   :  { %v692_v5 = vsel %vm330_vm4, %v686_v4, %v2179_v41  ;;  %v693_v54 = vsel %vm330_vm4, %v2180_v40, %v686_v4  ;;  %1960 = vmatprep.subr.bf16.mxu0 %v1959_v49  ;;  %1973 = vmatprep.subr.bf16.mxu1 %v2328_v3 }
 0x61d   :  { %v1961_v6 = vpack.c.bf16 %v692_v5, %v2633_v12  ;;  %v1974_v55 = vpack.c.bf16 %v693_v54, %v2639_v16  ;;  %v701_v16 = vsel %vm340_vm6, %v695_v2, %v2184_v8  ;;  %v2348_v2 = vmov 5   ;;  %v2743_v54 = vld [vmem:[%s3058_s3] sm:$0xff] }
 0x61e   :  { %v715_v14 = vpop.permute.xlu0 %714  ;;  %2192 = vset.pattern.permute.xlu1 %v2348_v2 }
 0x61f   :  { %v2188_v9 = vpop.permute.xlu1 %2187  ;;  %1962 = vmatpush1.bf16.msra.mxu0 %v1961_v6  ;;  %1975 = vmatpush3.bf16.msra.mxu1 %v1974_v55  ;;  %v2351_v55 = vmov 6  }
 0x620   :  { %v2190_v10 = vunpack.i.h.bf16 %v2188_v9  ;;  %v2189_v11 = vunpack.i.l.bf16 %v2188_v9  ;;  %1976 = vmatprep.subr.bf16.mxu1 %v2328_v3  ;;  %2193 = vset.pattern.permute.xlu0 %v2351_v55 }
 0x622   :  { %v709_v48 = vsel %vm350_vm5, %v2189_v11, %v2190_v10  ;;  %v713_v23 = vpop.permute.xlu0 %712 }
 0x623   :  { %v704_v53 = vpop.permute.xlu1 %703  ;;  %v1963_v12 = vpack.c.bf16 %v709_v48, %v700_v44  ;;  %v719_v27 = vsel %vm360_vm7, %v713_v23, %v715_v14 }
 0x624   :  { %v710_v19 = vsel %vm350_vm5, %v704_v53, %v2189_v11  ;;  %v711_v20 = vsel %vm350_vm5, %v2190_v10, %v704_v53 }
 0x625   :  { %v1965_v21 = vpack.c.bf16 %v710_v19, %v701_v16  ;;  %v1977_v22 = vpack.c.bf16 %v711_v20, %v702_v17  ;;  %1964 = vmatprep.subr.bf16.mxu0 %v1963_v12 }
 0x627   :  { %v717_v24 = vpop.permute.xlu1 %716  ;;  %1966 = vmatpush1.bf16.msra.mxu0 %v1965_v21  ;;  %1978 = vmatpush3.bf16.msra.mxu1 %v1977_v22 }
 0x628   :  { %v718_v25 = vsel %vm360_vm7, %v715_v14, %v717_v24  ;;  %1848 = vmatprep.subr.mxu1 %v2331_v13  ;;  %v720_v28 = vsel %vm360_vm7, %v717_v24, %v713_v23 }
 0x629   :  { %746 = vmatprep.subr.mxu0 %v718_v25 }
 0x62b   :  { %747 = vmatpush1.msra.mxu0 %v719_v27  ;;  %1849 = vmatpush3.msra.mxu1 %v720_v28 }
 0x62c   :  { %1735 = vmatmul.mubr.msk.f32.vlgmr.msra.gmra.mrb[4].mxu0 %vm369_vm8, %v1734_v26  ;;  %1851 = vmatmul.mubr.msk.f32.vlgmr.msra.gmra.mrb[4].mxu1 %vm369_vm8, %v1734_v26 }
 0x62d   :  { %1995 = vmatprep.subr.bf16.mxu1 %v2328_v3  ;;  %1151 = vmatprep.mubr.f32.mxu0 %v2331_v13 }
 0x62e   :  { %1871 = vmatprep.mubr.msk.f32.mxu1 %vm3076_vm9, %v2331_v13 }
 0x638   :  { %v725_v29 = vpop.permute.xlu1 %724 }
 0x6ff   :  { %v796_v30 = vpop.f32.mrb[4].mxu0  ;;  %v867_v15 = vpop.f32.mrb[4].mxu1 }
 0x700   :  { %v797_v31 = vadd.f32 %v796_v30, %v725_v29  ;;  %v868_v32 = vadd.f32 %v867_v15, %v725_v29  ;;  %v798_v33 = vpop.f32.mrb[5].mxu0  ;;  %v1852_v34 = vpop.f32.mrb[5].mxu1 }
 0x701   :  { %v799_v35 = vadd.f32 %v798_v33, %v725_v29 }
 0x702   :  { %v871_v36 = vmul.f32 %v2488_v46, %v797_v31  ;;  %v873_v39 = vmul.f32 %v2482_v38, %v868_v32 }
 0x703   :  { %v872_v37 = vmul.f32 %v2491_v47, %v799_v35 }
 0x704   :  { %v878_v40 = vmul.f32 %v871_v36, %v797_v31  ;;  %v880_v45 = vmul.f32 %v873_v39, %v868_v32 }
 0x705   :  { %v879_v41 = vmul.f32 %v872_v37, %v799_v35  ;;  %v874_v42 = vadd.f32 %v872_v37, %v871_v36 }
 0x707   :  { %v875_v43 = vadd.f32 %v874_v42, %v873_v39  ;;  %v881_v50 = vadd.f32 %v879_v41, %v878_v40 }
 0x709   :  { %876 = vadd.xlane.f32.xlu0 %v875_v43  ;;  %v882_v51 = vadd.f32 %v881_v50, %v880_v45 }
 0x70b   :  { %883 = vadd.xlane.f32.xlu1 %v882_v51 }
 0x796   :  { %v877_v52 = vpop.xlane.xlu0 %876 }
 0x797   :  { %v885_v56 = vrot.slane %v877_v52, 4 }
 0x798   :  { %v884_v57 = vpop.xlane.xlu1 %883 }
 0x799   :  { %v886_v58 = vadd.f32 %v885_v56, %v877_v52  ;;  %v887_v59 = vrot.slane %v884_v57, 4 }
 0x79b   :  { %v889_v61 = vmul.f32 0.001953125, %v886_v58  ;;  %v888_v62 = vadd.f32 %v887_v59, %v884_v57 }
 0x79d   :  { %v891_v63 = vmul.f32 %v889_v61, %v889_v61  ;;  %v890_v0 = vmul.f32 0.001953125, %v888_v62 }
 0x79f   :  { %v892_v1 = vsub.f32 %v890_v0, %v891_v63 }
 0x7a1   :  { %v893_v49 = vadd.f32 1e-05, %v892_v1 }
 0x7a3   :  { %2284 = vrsqrt.f32 %v893_v49 }
 0x7ad   :  { %v2285_v4 = vpop.eup %2284 }
 0x7ae   :  { %896 = vrot.lane.b32.xlu0 %v2285_v4, %s2349_s18 }
 0x820   :  { %v897_v5 = vpop.permute.xlu0 %896 }
 0x821   :  { %v899_v6 = vmul.f32 %v2743_v54, %v897_v5 }
 0x823   :  { %901 = vrot.lane.b32.xlu1 %v899_v6, %s2350_s21 }
 0x827   :  { %911 = vperm.xlu1 %2192, %v899_v6  }
 0x895   :  { %v902_v7 = vpop.permute.xlu1 %901 }
 0x896   :  { %v904_v8 = vmul.f32 %v902_v7, %v889_v61 }
 0x898   :  { %906 = vrot.lane.b32.xlu0 %v904_v8, %s2352_s22 }
 0x8a6   :  { %v912_v11 = vpop.permute.xlu1 %911 }
 0x8a7   :  { %v914_v14 = vmul.f32 %v912_v11, %v797_v31  ;;  %v915_v44 = vmul.f32 %v912_v11, %v799_v35  ;;  %v916_v48 = vmul.f32 %v912_v11, %v868_v32 }
 0x90a   :  { %v907_v9 = vpop.permute.xlu0 %906 }
 0x90b   :  { %v909_v10 = vsub.f32 %v2743_v54, %v907_v9 }
 0x90d   :  { %919 = vperm.xlu0 %2193, %v909_v10  }
 0x98c   :  { %v920_v53 = vpop.permute.xlu0 %919 }
 0x98d   :  { %v2747_v12 = vadd.f32 %v920_v53, %v914_v14  ;;  %v2749_v16 = vadd.f32 %v920_v53, %v915_v44  ;;  %v2751_v17 = vadd.f32 %v920_v53, %v916_v48 }
 0x98f   :  { %v2754_v19 = vmul.f32 0.70710677, %v2747_v12  ;;  %v2757_v20 = vmul.f32 0.70710677, %v2749_v16  ;;  %v2760_v21 = vmul.f32 0.70710677, %v2751_v17 }
 0x991   :  { %v937_v22 = vand.u32 2147483647, %v2754_v19  ;;  %v938_v23 = vand.u32 2147483647, %v2757_v20  ;;  %v939_v24 = vand.u32 2147483647, %v2760_v21 }
 0x992   :  { %vm931_vm10 = vcmp.lt.f32.partialorder %v2754_v19, 0.0  ;;  %vm932_vm11 = vcmp.lt.f32.partialorder %v2757_v20, 0.0  ;;  %vm933_vm12 = vcmp.lt.f32.partialorder %v2760_v21, 0.0  ;;  %v926_v20 = vmul.f32 0.5, %v2749_v16 }
 0x993   :  { %v940_v25 = vmul.f32 0.3275911, %v937_v22  ;;  %v941_v26 = vmul.f32 0.3275911, %v938_v23  ;;  %v942_v27 = vmul.f32 0.3275911, %v939_v24 }
 0x994   :  { %v976_v15 = vsub.f32 0.0, %v937_v22  ;;  %v977_v31 = vsub.f32 0.0, %v938_v23  ;;  %v978_v32 = vsub.f32 0.0, %v939_v24  ;;  %v927_v21 = vmul.f32 0.5, %v2751_v17 }
 0x995   :  { %v943_v28 = vadd.f32 1.0, %v940_v25  ;;  %v944_v29 = vadd.f32 1.0, %v941_v26  ;;  %v945_v30 = vadd.f32 1.0, %v942_v27  ;;  %v934_v27 = vsel %vm931_vm10, -1.0, %v2346_v60 }
 0x996   :  { %v979_v34 = vmul.f32 %v976_v15, %v937_v22  ;;  %v980_v37 = vmul.f32 %v977_v31, %v938_v23  ;;  %v981_v41 = vmul.f32 %v978_v32, %v939_v24  ;;  %v936_v31 = vsel %vm933_vm12, -1.0, %v2346_v60 }
 0x997   :  { %2286 = vrcp.f32 %v943_v28  ;;  %v925_v32 = vmul.f32 0.5, %v2747_v12  ;;  %v2353_v17 = vmov 7   ;;  %vm3089_vm10 = vcmp.lt.s32.totalorder %v2428_v18, 1 }
 0x998   :  { %2288 = vrcp.f32 %v944_v29  ;;  %v982_v50 = vmul.f32 1.442695, %v979_v34  ;;  %v984_v56 = vmul.f32 1.442695, %v980_v37  ;;  %v986_v58 = vmul.f32 1.442695, %v981_v41  ;;  %2229 = vset.pattern.permute.xlu1 %v2353_v17  ;;  %vm3091_vm12 = vmmov %vm3089_vm10 }
 0x999   :  { %2290 = vrcp.f32 %v945_v30  ;;  %v935_v29 = vsel %vm932_vm11, -1.0, %v2346_v60  ;;  %vm3090_vm11 = vmmov %vm3089_vm10 }
 0x99a   :  { %2292 = vpow2.f32 %v982_v50 }
 0x99b   :  { %2294 = vpow2.f32 %v984_v56 }
 0x99c   :  { %2296 = vpow2.f32 %v986_v58 }
 0x9a1   :  { %v2287_v33 = vpop.eup %2286 }
 0x9a2   :  { %v2289_v35 = vpop.eup %2288  ;;  %v949_v36 = vmul.f32 1.0614054, %v2287_v33 }
 0x9a3   :  { %v2291_v39 = vpop.eup %2290  ;;  %v950_v40 = vmul.f32 1.0614054, %v2289_v35 }
 0x9a4   :  { %v951_v42 = vmul.f32 1.0614054, %v2291_v39  ;;  %v952_v43 = vadd.f32 -1.4531521, %v949_v36  ;;  %v2293_v14 = vpop.eup %2292 }
 0x9a5   :  { %v953_v45 = vadd.f32 -1.4531521, %v950_v40  ;;  %v2295_v48 = vpop.eup %2294 }
 0x9a6   :  { %v954_v51 = vadd.f32 -1.4531521, %v951_v42  ;;  %v955_v52 = vmul.f32 %v2287_v33, %v952_v43  ;;  %v2297_v23 = vpop.eup %2296 }
 0x9a7   :  { %v956_v57 = vmul.f32 %v2289_v35, %v953_v45 }
 0x9a8   :  { %v957_v59 = vmul.f32 %v2291_v39, %v954_v51  ;;  %v958_v61 = vadd.f32 1.4214138, %v955_v52 }
 0x9a9   :  { %v959_v62 = vadd.f32 1.4214138, %v956_v57 }
 0x9aa   :  { %v960_v63 = vadd.f32 1.4214138, %v957_v59  ;;  %v961_v0 = vmul.f32 %v2287_v33, %v958_v61 }
 0x9ab   :  { %v962_v1 = vmul.f32 %v2289_v35, %v959_v62 }
 0x9ac   :  { %v963_v49 = vmul.f32 %v2291_v39, %v960_v63  ;;  %v964_v2 = vadd.f32 -0.28449672, %v961_v0 }
 0x9ad   :  { %v965_v4 = vadd.f32 -0.28449672, %v962_v1 }
 0x9ae   :  { %v966_v5 = vadd.f32 -0.28449672, %v963_v49  ;;  %v967_v6 = vmul.f32 %v2287_v33, %v964_v2 }
 0x9af   :  { %v968_v55 = vmul.f32 %v2289_v35, %v965_v4 }
 0x9b0   :  { %v969_v7 = vmul.f32 %v2291_v39, %v966_v5  ;;  %v970_v8 = vadd.f32 0.2548296, %v967_v6 }
 0x9b1   :  { %v971_v9 = vadd.f32 0.2548296, %v968_v55 }
 0x9b2   :  { %v972_v10 = vadd.f32 0.2548296, %v969_v7  ;;  %v973_v11 = vmul.f32 %v2287_v33, %v970_v8 }
 0x9b3   :  { %v974_v44 = vmul.f32 %v2289_v35, %v971_v9 }
 0x9b4   :  { %v975_v53 = vmul.f32 %v2291_v39, %v972_v10  ;;  %v988_v22 = vmul.f32 %v2293_v14, %v973_v11 }
 0x9b5   :  { %v989_v24 = vmul.f32 %v2295_v48, %v974_v44 }
 0x9b6   :  { %v990_v25 = vmul.f32 %v2297_v23, %v975_v53  ;;  %v991_v26 = vsub.f32 1.0, %v988_v22 }
 0x9b7   :  { %v992_v28 = vsub.f32 1.0, %v989_v24 }
 0x9b8   :  { %v993_v30 = vsub.f32 1.0, %v990_v25  ;;  %v994_v15 = vmul.f32 %v991_v26, %v934_v27 }
 0x9b9   :  { %v995_v19 = vmul.f32 %v992_v28, %v935_v29 }
 0x9ba   :  { %v996_v33 = vmul.f32 %v993_v30, %v936_v31  ;;  %v997_v34 = vadd.f32 1.0, %v994_v15 }
 0x9bb   :  { %v998_v35 = vadd.f32 1.0, %v995_v19 }
 0x9bc   :  { %v999_v36 = vadd.f32 1.0, %v996_v33  ;;  %v1000_v37 = vmul.f32 %v997_v34, %v925_v32 }
 0x9bd   :  { %v1001_v39 = vmul.f32 %v998_v35, %v926_v20 }
 0x9be   :  { %v1002_v40 = vmul.f32 %v999_v36, %v927_v21  ;;  %v2775_v41 = vmul.f32 %v2488_v46, %v1000_v37 }
 0x9bf   :  { %v2778_v42 = vmul.f32 %v2491_v47, %v1001_v39 }
 0x9c0   :  { %v2781_v43 = vmul.f32 %v2482_v38, %v1002_v40 }
 0x9c1   :  { %v2194_v12 = vpack.i.bf16 %v2778_v42, %v2775_v41 }
 0x9c2   :  { %1010 = vrot.lane.b32.xlu0 %v2781_v43, %s2333_s0  ;;  %v2214_v16 = vpack.i.bf16 %v2781_v43, %v2778_v42 }
 0x9c3   :  { %2195 = vrot.lane.b32.xlu1 %v2194_v12, %s2333_s0 }
 0x9c6   :  { %2205 = vrot.lane.b32.xlu0 %v2194_v12, %s2335_s1 }
 0x9c7   :  { %2200 = vrot.lane.b32.xlu1 %v2194_v12, %s2330_s28 }
 0x9ca   :  { %1028 = vrot.lane.b32.xlu0 %v2781_v43, %s2335_s1 }
 0x9cb   :  { %1019 = vrot.lane.b32.xlu1 %v2781_v43, %s2330_s28 }
 0x9ce   :  { %2215 = vrot.lane.b32.xlu0 %v2214_v16, %s2336_s7 }
 0x9cf   :  { %2210 = vrot.lane.b32.xlu1 %v2194_v12, %s2329_s27 }
 0x9d2   :  { %2220 = vrot.lane.b32.xlu0 %v2214_v16, %s2337_s8 }
 0x9d3   :  { %1037 = vrot.lane.b32.xlu1 %v2781_v43, %s2329_s27 }
 0x9d6   :  { %1051 = vrot.lane.b32.xlu0 %v2775_v41, %s2337_s8 }
 0x9d7   :  { %1042 = vrot.lane.b32.xlu1 %v2775_v41, %s2336_s7 }
 0x9da   :  { %1071 = vrot.lane.b32.xlu0 %v2778_v42, %s2340_s10 }
 0x9db   :  { %2225 = vrot.lane.b32.xlu1 %v2214_v16, %s2338_s9 }
 0x9de   :  { %1069 = vrot.lane.b32.xlu0 %v2775_v41, %s2340_s10 }
 0x9df   :  { %1060 = vrot.lane.b32.xlu1 %v2775_v41, %s2338_s9 }
 0x9e3   :  { %1073 = vrot.lane.b32.xlu1 %v2781_v43, %s2340_s10 }
 0x9e7   :  { %1081 = vperm.xlu1 %2229, %v2743_v54  }
 0xa34   :  { %v1011_v45 = vpop.permute.xlu0 %1010 }
 0xa35   :  { %v2196_v50 = vpop.permute.xlu1 %2195 }
 0xa36   :  { %v2198_v51 = vunpack.i.h.bf16 %v2196_v50  ;;  %v2197_v52 = vunpack.i.l.bf16 %v2196_v50 }
 0xa38   :  { %v2206_v56 = vpop.permute.xlu0 %2205  ;;  %v1013_v62 = vsel %vm3079_vm13, %v2197_v52, %v2198_v51  ;;  %v1012_v49 = vsel %vm3085_vm15, %v2198_v51, %v1011_v45  ;;  %v1014_v2 = vsel %vm3086_vm1, %v1011_v45, %v2197_v52  ;;  %vm3092_vm15 = vmmov %vm3086_vm1 }
 0xa39   :  { %v2201_v57 = vpop.permute.xlu1 %2200  ;;  %v2208_v7 = vunpack.i.h.bf16 %v2206_v56  ;;  %v2207_v8 = vunpack.i.l.bf16 %v2206_v56  ;;  %vm3093_vm1 = vmmov %vm3087_vm2 }
 0xa3a   :  { %v2203_v58 = vunpack.i.h.bf16 %v2201_v57  ;;  %v2202_v59 = vunpack.i.l.bf16 %v2201_v57 }
 0xa3b   :  { %v1031_v22 = vsel %vm311_vm0, %v2207_v8, %v2208_v7 }
 0xa3c   :  { %v1029_v61 = vpop.permute.xlu0 %1028  ;;  %v1022_v63 = vsel %vm3080_vm14, %v2202_v59, %v2203_v58 }
 0xa3d   :  { %v1020_v0 = vpop.permute.xlu1 %1019  ;;  %v1979_v1 = vpack.c.bf16 %v1022_v63, %v1013_v62  ;;  %v1030_v27 = vsel %vm311_vm0, %v2208_v7, %v1029_v61  ;;  %v1032_v28 = vsel %vm311_vm0, %v1029_v61, %v2207_v8  ;;  %v1737_v62 = vld [vmem:[%s3060_s2 + $0x10] sm:$0xff] }
 0xa3e   :  { %v1021_v4 = vsel %vm3087_vm2, %v2203_v58, %v1020_v0  ;;  %v1023_v5 = vsel %vm3088_vm3, %v1020_v0, %v2202_v59  ;;  %vm3094_vm2 = vmmov %vm3092_vm15 }
 0xa3f   :  { %v1981_v6 = vpack.c.bf16 %v1023_v5, %v1014_v2  ;;  %v1996_v55 = vpack.c.bf16 %v1021_v4, %v1012_v49  ;;  %1980 = vmatprep.subr.bf16.mxu0 %v1979_v1  ;;  %vm3095_vm3 = vmmov %vm3094_vm2 }
 0xa40   :  { %v2216_v9 = vpop.permute.xlu0 %2215 }
 0xa41   :  { %v2218_v10 = vunpack.i.h.bf16 %v2216_v9  ;;  %v2217_v11 = vunpack.i.l.bf16 %v2216_v9  ;;  %v2211_v14 = vpop.permute.xlu1 %2210  ;;  %1982 = vmatpush1.bf16.msra.mxu0 %v1981_v6  ;;  %1997 = vmatpush3.bf16.msra.mxu1 %v1996_v55 }
 0xa42   :  { %v2213_v44 = vunpack.i.h.bf16 %v2211_v14  ;;  %v2212_v48 = vunpack.i.l.bf16 %v2211_v14  ;;  %1998 = vmatprep.subr.bf16.mxu1 %v2328_v3 }
 0xa43   :  { %v1048_v26 = vsel %vm330_vm4, %v2217_v11, %v2218_v10 }
 0xa44   :  { %v2221_v53 = vpop.permute.xlu0 %2220  ;;  %v1040_v23 = vsel %vm3089_vm10, %v2212_v48, %v2213_v44  ;;  %v1987_v19 = vpack.c.bf16 %v1048_v26, %v2778_v42  ;;  %vm3096_vm10 = vmmov %vm3093_vm1 }
 0xa45   :  { %v1038_v24 = vpop.permute.xlu1 %1037  ;;  %v1983_v25 = vpack.c.bf16 %v1040_v23, %v1031_v22  ;;  %v2223_v36 = vunpack.i.h.bf16 %v2221_v53  ;;  %v2222_v37 = vunpack.i.l.bf16 %v2221_v53 }
 0xa46   :  { %v1039_v29 = vsel %vm3090_vm11, %v2213_v44, %v1038_v24  ;;  %v1041_v30 = vsel %vm3091_vm12, %v1038_v24, %v2212_v48  ;;  %vm3097_vm11 = vmmov %vm3093_vm1 }
 0xa47   :  { %v1985_v15 = vpack.c.bf16 %v1041_v30, %v1032_v28  ;;  %v1999_v31 = vpack.c.bf16 %v1039_v29, %v1030_v27  ;;  %1984 = vmatprep.subr.bf16.mxu0 %v1983_v25  ;;  %v1057_v16 = vsel %vm340_vm6, %v2222_v37, %v2223_v36 }
 0xa48   :  { %v1052_v32 = vpop.permute.xlu0 %1051 }
 0xa49   :  { %v1043_v33 = vpop.permute.xlu1 %1042  ;;  %1986 = vmatpush1.bf16.msra.mxu0 %v1985_v15  ;;  %2000 = vmatpush3.bf16.msra.mxu1 %v1999_v31  ;;  %v1059_v50 = vsel %vm340_vm6, %v2223_v36, %v1052_v32 }
 0xa4a   :  { %v1049_v34 = vsel %vm330_vm4, %v1043_v33, %v2217_v11  ;;  %v1050_v20 = vsel %vm330_vm4, %v2218_v10, %v1043_v33  ;;  %1988 = vmatprep.subr.bf16.mxu0 %v1987_v19  ;;  %2001 = vmatprep.subr.bf16.mxu1 %v2328_v3  ;;  %v2354_v33 = vmov 8  }
 0xa4b   :  { %v1989_v35 = vpack.c.bf16 %v1049_v34, %v2775_v41  ;;  %v2002_v21 = vpack.c.bf16 %v1050_v20, %v2781_v43  ;;  %v1058_v43 = vsel %vm340_vm6, %v1052_v32, %v2222_v37  ;;  %2230 = vset.pattern.permute.xlu1 %v2354_v33 }
 0xa4c   :  { %v1072_v12 = vpop.permute.xlu0 %1071 }
 0xa4d   :  { %v2226_v39 = vpop.permute.xlu1 %2225  ;;  %1990 = vmatpush1.bf16.msra.mxu0 %v1989_v35  ;;  %2003 = vmatpush3.bf16.msra.mxu1 %v2002_v21  ;;  %v2357_v21 = vmov 9  }
 0xa4e   :  { %v2228_v40 = vunpack.i.h.bf16 %v2226_v39  ;;  %v2227_v42 = vunpack.i.l.bf16 %v2226_v39  ;;  %2004 = vmatprep.subr.bf16.mxu1 %v2328_v3  ;;  %2231 = vset.pattern.permute.xlu0 %v2357_v21 }
 0xa50   :  { %v1066_v17 = vsel %vm350_vm5, %v2227_v42, %v2228_v40  ;;  %v1070_v58 = vpop.permute.xlu0 %1069 }
 0xa51   :  { %v1061_v45 = vpop.permute.xlu1 %1060  ;;  %v1991_v41 = vpack.c.bf16 %v1066_v17, %v1057_v16  ;;  %v1076_v63 = vsel %vm360_vm7, %v1070_v58, %v1072_v12 }
 0xa52   :  { %v1067_v51 = vsel %vm350_vm5, %v1061_v45, %v2227_v42  ;;  %v1068_v52 = vsel %vm350_vm5, %v2228_v40, %v1061_v45 }
 0xa53   :  { %v1993_v56 = vpack.c.bf16 %v1067_v51, %v1058_v43  ;;  %v2005_v57 = vpack.c.bf16 %v1068_v52, %v1059_v50  ;;  %1992 = vmatprep.subr.bf16.mxu0 %v1991_v41 }
 0xa55   :  { %v1074_v59 = vpop.permute.xlu1 %1073  ;;  %1994 = vmatpush1.bf16.msra.mxu0 %v1993_v56  ;;  %2006 = vmatpush3.bf16.msra.mxu1 %v2005_v57 }
 0xa56   :  { %v1075_v61 = vsel %vm360_vm7, %v1072_v12, %v1074_v59  ;;  %1869 = vmatprep.subr.mxu1 %v2331_v13  ;;  %v1077_v0 = vsel %vm360_vm7, %v1074_v59, %v1070_v58 }
 0xa57   :  { %1103 = vmatprep.subr.mxu0 %v1075_v61 }
 0xa59   :  { %1104 = vmatpush1.msra.mxu0 %v1076_v63  ;;  %1870 = vmatpush3.msra.mxu1 %v1077_v0 }
 0xa5a   :  { %1738 = vmatmul.mubr.msk.f32.vlgmr.msra.gmra.mrb[6].mxu0 %vm369_vm8, %v1737_v62  ;;  %1872 = vmatmul.mubr.msk.f32.vlgmr.msra.gmra.mrb[6].mxu1 %vm369_vm8, %v1737_v62 }
 0xa5b   :  { %2023 = vmatprep.subr.bf16.mxu1 %v2328_v3  ;;  %1508 = vmatprep.mubr.f32.mxu0 %v2331_v13 }
 0xa5c   :  { %1892 = vmatprep.mubr.msk.f32.mxu1 %vm3076_vm9, %v2331_v13 }
 0xa66   :  { %v1082_v1 = vpop.permute.xlu1 %1081 }
 0xb2d   :  { %v1153_v49 = vpop.f32.mrb[6].mxu0  ;;  %v1224_v2 = vpop.f32.mrb[6].mxu1 }
 0xb2e   :  { %v1154_v4 = vadd.f32 %v1153_v49, %v1082_v1  ;;  %v1225_v5 = vadd.f32 %v1224_v2, %v1082_v1  ;;  %v1155_v6 = vpop.f32.mrb[7].mxu0  ;;  %v1873_v55 = vpop.f32.mrb[7].mxu1 }
 0xb2f   :  { %v1156_v7 = vadd.f32 %v1155_v6, %v1082_v1 }
 0xb30   :  { %v1228_v8 = vmul.f32 %v2488_v46, %v1154_v4  ;;  %v1230_v10 = vmul.f32 %v2482_v38, %v1225_v5 }
 0xb31   :  { %v1229_v9 = vmul.f32 %v2491_v47, %v1156_v7 }
 0xb32   :  { %v1235_v11 = vmul.f32 %v1228_v8, %v1154_v4  ;;  %v1237_v53 = vmul.f32 %v1230_v10, %v1225_v5 }
 0xb33   :  { %v1236_v14 = vmul.f32 %v1229_v9, %v1156_v7  ;;  %v1231_v44 = vadd.f32 %v1229_v9, %v1228_v8 }
 0xb35   :  { %v1232_v48 = vadd.f32 %v1231_v44, %v1230_v10  ;;  %v1238_v22 = vadd.f32 %v1236_v14, %v1235_v11 }
 0xb37   :  { %1233 = vadd.xlane.f32.xlu0 %v1232_v48  ;;  %v1239_v23 = vadd.f32 %v1238_v22, %v1237_v53 }
 0xb39   :  { %1240 = vadd.xlane.f32.xlu1 %v1239_v23 }
 0xbc4   :  { %v1234_v24 = vpop.xlane.xlu0 %1233 }
 0xbc5   :  { %v1242_v25 = vrot.slane %v1234_v24, 4 }
 0xbc6   :  { %v1241_v26 = vpop.xlane.xlu1 %1240 }
 0xbc7   :  { %v1243_v27 = vadd.f32 %v1242_v25, %v1234_v24  ;;  %v1244_v28 = vrot.slane %v1241_v26, 4 }
 0xbc9   :  { %v1246_v29 = vmul.f32 0.001953125, %v1243_v27  ;;  %v1245_v30 = vadd.f32 %v1244_v28, %v1241_v26 }
 0xbcb   :  { %v1248_v15 = vmul.f32 %v1246_v29, %v1246_v29  ;;  %v1247_v31 = vmul.f32 0.001953125, %v1245_v30 }
 0xbcd   :  { %v1249_v19 = vsub.f32 %v1247_v31, %v1248_v15 }
 0xbcf   :  { %v1250_v32 = vadd.f32 1e-05, %v1249_v19 }
 0xbd1   :  { %2298 = vrsqrt.f32 %v1250_v32 }
 0xbdb   :  { %v2299_v34 = vpop.eup %2298 }
 0xbdc   :  { %1253 = vrot.lane.b32.xlu0 %v2299_v34, %s2355_s25 }
 0xc4e   :  { %v1254_v20 = vpop.permute.xlu0 %1253 }
 0xc4f   :  { %v1256_v35 = vmul.f32 %v2743_v54, %v1254_v20 }
 0xc51   :  { %1258 = vrot.lane.b32.xlu1 %v1256_v35, %s2356_s26 }
 0xc55   :  { %1268 = vperm.xlu1 %2230, %v1256_v35  }
 0xcc3   :  { %v1259_v36 = vpop.permute.xlu1 %1258 }
 0xcc4   :  { %v1261_v37 = vmul.f32 %v1259_v36, %v1246_v29 }
 0xcc6   :  { %1263 = vrot.lane.b32.xlu0 %v1261_v37, %s2358_s29 }
 0xcd4   :  { %v1269_v42 = vpop.permute.xlu1 %1268 }
 0xcd5   :  { %v1271_v12 = vmul.f32 %v1269_v42, %v1154_v4  ;;  %v1272_v16 = vmul.f32 %v1269_v42, %v1156_v7  ;;  %v1273_v17 = vmul.f32 %v1269_v42, %v1225_v5 }
 0xd38   :  { %v1264_v39 = vpop.permute.xlu0 %1263 }
 0xd39   :  { %v1266_v40 = vsub.f32 %v2743_v54, %v1264_v39 }
 0xd3b   :  { %1276 = vperm.xlu0 %2231, %v1266_v40  }
 0xdba   :  { %v1277_v45 = vpop.permute.xlu0 %1276 }
 0xdbb   :  { %v2884_v41 = vadd.f32 %v1277_v45, %v1271_v12  ;;  %v2886_v43 = vadd.f32 %v1277_v45, %v1272_v16  ;;  %v2888_v50 = vadd.f32 %v1277_v45, %v1273_v17 }
 0xdbd   :  { %v2891_v51 = vmul.f32 0.70710677, %v2884_v41  ;;  %v2894_v52 = vmul.f32 0.70710677, %v2886_v43  ;;  %v2897_v56 = vmul.f32 0.70710677, %v2888_v50 }
 0xdbf   :  { %v1294_v57 = vand.u32 2147483647, %v2891_v51  ;;  %v1295_v58 = vand.u32 2147483647, %v2894_v52  ;;  %v1296_v59 = vand.u32 2147483647, %v2897_v56 }
 0xdc0   :  { %vm1288_vm9 = vcmp.lt.f32.partialorder %v2891_v51, 0.0  ;;  %vm1289_vm13 = vcmp.lt.f32.partialorder %v2894_v52, 0.0  ;;  %vm1290_vm14 = vcmp.lt.f32.partialorder %v2897_v56, 0.0  ;;  %v1283_v52 = vmul.f32 0.5, %v2886_v43 }
 0xdc1   :  { %v1297_v61 = vmul.f32 0.3275911, %v1294_v57  ;;  %v1298_v62 = vmul.f32 0.3275911, %v1295_v58  ;;  %v1299_v63 = vmul.f32 0.3275911, %v1296_v59 }
 0xdc2   :  { %v1333_v2 = vsub.f32 0.0, %v1294_v57  ;;  %v1334_v4 = vsub.f32 0.0, %v1295_v58  ;;  %v1335_v5 = vsub.f32 0.0, %v1296_v59  ;;  %v1284_v56 = vmul.f32 0.5, %v2888_v50 }
 0xdc3   :  { %v1300_v0 = vadd.f32 1.0, %v1297_v61  ;;  %v1301_v1 = vadd.f32 1.0, %v1298_v62  ;;  %v1302_v49 = vadd.f32 1.0, %v1299_v63  ;;  %v1291_v63 = vsel %vm1288_vm9, -1.0, %v2346_v60  ;;  %vm3098_vm9 = vmmov %vm3091_vm12 }
 0xdc4   :  { %v1336_v55 = vmul.f32 %v1333_v2, %v1294_v57  ;;  %v1337_v9 = vmul.f32 %v1334_v4, %v1295_v58  ;;  %v1338_v14 = vmul.f32 %v1335_v5, %v1296_v59  ;;  %v1293_v4 = vsel %vm1290_vm14, -1.0, %v2346_v60 }
 0xdc5   :  { %2300 = vrcp.f32 %v1300_v0  ;;  %v1282_v5 = vmul.f32 0.5, %v2884_v41  ;;  %v2359_v50 = vmov 10  }
 0xdc6   :  { %2302 = vrcp.f32 %v1301_v1  ;;  %v1339_v22 = vmul.f32 1.442695, %v1336_v55  ;;  %v1341_v25 = vmul.f32 1.442695, %v1337_v9  ;;  %v1343_v27 = vmul.f32 1.442695, %v1338_v14  ;;  %2267 = vset.pattern.permute.xlu1 %v2359_v50 }
 0xdc7   :  { %2304 = vrcp.f32 %v1302_v49  ;;  %v1292_v1 = vsel %vm1289_vm13, -1.0, %v2346_v60  ;;  %vm3099_vm13 = vmmov %vm3098_vm9 }
 0xdc8   :  { %2306 = vpow2.f32 %v1339_v22 }
 0xdc9   :  { %2308 = vpow2.f32 %v1341_v25 }
 0xdca   :  { %2310 = vpow2.f32 %v1343_v27 }
 0xdcf   :  { %v2301_v6 = vpop.eup %2300 }
 0xdd0   :  { %v2303_v7 = vpop.eup %2302  ;;  %v1306_v8 = vmul.f32 1.0614054, %v2301_v6 }
 0xdd1   :  { %v2305_v10 = vpop.eup %2304  ;;  %v1307_v11 = vmul.f32 1.0614054, %v2303_v7 }
 0xdd2   :  { %v1308_v44 = vmul.f32 1.0614054, %v2305_v10  ;;  %v1309_v48 = vadd.f32 -1.4531521, %v1306_v8  ;;  %v2307_v12 = vpop.eup %2306 }
 0xdd3   :  { %v1310_v53 = vadd.f32 -1.4531521, %v1307_v11  ;;  %v2309_v17 = vpop.eup %2308 }
 0xdd4   :  { %v1311_v23 = vadd.f32 -1.4531521, %v1308_v44  ;;  %v1312_v24 = vmul.f32 %v2301_v6, %v1309_v48  ;;  %v2311_v58 = vpop.eup %2310 }
 0xdd5   :  { %v1313_v26 = vmul.f32 %v2303_v7, %v1310_v53 }
 0xdd6   :  { %v1314_v28 = vmul.f32 %v2305_v10, %v1311_v23  ;;  %v1315_v29 = vadd.f32 1.4214138, %v1312_v24 }
 0xdd7   :  { %v1316_v30 = vadd.f32 1.4214138, %v1313_v26 }
 0xdd8   :  { %v1317_v15 = vadd.f32 1.4214138, %v1314_v28  ;;  %v1318_v31 = vmul.f32 %v2301_v6, %v1315_v29 }
 0xdd9   :  { %v1319_v19 = vmul.f32 %v2303_v7, %v1316_v30 }
 0xdda   :  { %v1320_v32 = vmul.f32 %v2305_v10, %v1317_v15  ;;  %v1321_v33 = vadd.f32 -0.28449672, %v1318_v31 }
 0xddb   :  { %v1322_v34 = vadd.f32 -0.28449672, %v1319_v19 }
 0xddc   :  { %v1323_v20 = vadd.f32 -0.28449672, %v1320_v32  ;;  %v1324_v35 = vmul.f32 %v2301_v6, %v1321_v33 }
 0xddd   :  { %v1325_v21 = vmul.f32 %v2303_v7, %v1322_v34 }
 0xdde   :  { %v1326_v36 = vmul.f32 %v2305_v10, %v1323_v20  ;;  %v1327_v37 = vadd.f32 0.2548296, %v1324_v35 }
 0xddf   :  { %v1328_v39 = vadd.f32 0.2548296, %v1325_v21 }
 0xde0   :  { %v1329_v40 = vadd.f32 0.2548296, %v1326_v36  ;;  %v1330_v42 = vmul.f32 %v2301_v6, %v1327_v37 }
 0xde1   :  { %v1331_v16 = vmul.f32 %v2303_v7, %v1328_v39 }
 0xde2   :  { %v1332_v45 = vmul.f32 %v2305_v10, %v1329_v40  ;;  %v1345_v57 = vmul.f32 %v2307_v12, %v1330_v42 }
 0xde3   :  { %v1346_v59 = vmul.f32 %v2309_v17, %v1331_v16 }
 0xde4   :  { %v1347_v61 = vmul.f32 %v2311_v58, %v1332_v45  ;;  %v1348_v62 = vsub.f32 1.0, %v1345_v57 }
 0xde5   :  { %v1349_v0 = vsub.f32 1.0, %v1346_v59 }
 0xde6   :  { %v1350_v49 = vsub.f32 1.0, %v1347_v61  ;;  %v1351_v2 = vmul.f32 %v1348_v62, %v1291_v63 }
 0xde7   :  { %v1352_v51 = vmul.f32 %v1349_v0, %v1292_v1 }
 0xde8   :  { %v1353_v6 = vmul.f32 %v1350_v49, %v1293_v4  ;;  %v1354_v55 = vadd.f32 1.0, %v1351_v2 }
 0xde9   :  { %v1355_v7 = vadd.f32 1.0, %v1352_v51 }
 0xdea   :  { %v1356_v8 = vadd.f32 1.0, %v1353_v6  ;;  %v1357_v9 = vmul.f32 %v1354_v55, %v1282_v5 }
 0xdeb   :  { %v1358_v10 = vmul.f32 %v1355_v7, %v1283_v52 }
 0xdec   :  { %v1359_v11 = vmul.f32 %v1356_v8, %v1284_v56  ;;  %v2912_v14 = vmul.f32 %v2488_v46, %v1357_v9 }
 0xded   :  { %v2915_v44 = vmul.f32 %v2491_v47, %v1358_v10 }
 0xdee   :  { %v2918_v48 = vmul.f32 %v2482_v38, %v1359_v11 }
 0xdef   :  { %v2232_v41 = vpack.i.bf16 %v2915_v44, %v2912_v14 }
 0xdf0   :  { %1367 = vrot.lane.b32.xlu0 %v2918_v48, %s2333_s0  ;;  %v2252_v43 = vpack.i.bf16 %v2918_v48, %v2915_v44 }
 0xdf1   :  { %2233 = vrot.lane.b32.xlu1 %v2232_v41, %s2333_s0 }
 0xdf4   :  { %2243 = vrot.lane.b32.xlu0 %v2232_v41, %s2335_s1 }
 0xdf5   :  { %2238 = vrot.lane.b32.xlu1 %v2232_v41, %s2330_s28 }
 0xdf8   :  { %1385 = vrot.lane.b32.xlu0 %v2918_v48, %s2335_s1 }
 0xdf9   :  { %1376 = vrot.lane.b32.xlu1 %v2918_v48, %s2330_s28 }
 0xdfc   :  { %2253 = vrot.lane.b32.xlu0 %v2252_v43, %s2336_s7 }
 0xdfd   :  { %2248 = vrot.lane.b32.xlu1 %v2232_v41, %s2329_s27 }
 0xe00   :  { %2258 = vrot.lane.b32.xlu0 %v2252_v43, %s2337_s8 }
 0xe01   :  { %1394 = vrot.lane.b32.xlu1 %v2918_v48, %s2329_s27 }
 0xe04   :  { %1408 = vrot.lane.b32.xlu0 %v2912_v14, %s2337_s8 }
 0xe05   :  { %1399 = vrot.lane.b32.xlu1 %v2912_v14, %s2336_s7 }
 0xe08   :  { %1428 = vrot.lane.b32.xlu0 %v2915_v44, %s2340_s10 }
 0xe09   :  { %2263 = vrot.lane.b32.xlu1 %v2252_v43, %s2338_s9 }
 0xe0c   :  { %1426 = vrot.lane.b32.xlu0 %v2912_v14, %s2340_s10 }
 0xe0d   :  { %1417 = vrot.lane.b32.xlu1 %v2912_v14, %s2338_s9 }
 0xe11   :  { %1430 = vrot.lane.b32.xlu1 %v2918_v48, %s2340_s10 }
 0xe15   :  { %1438 = vperm.xlu1 %2267, %v2743_v54  }
 0xe62   :  { %v1368_v53 = vpop.permute.xlu0 %1367 }
 0xe63   :  { %v2234_v22 = vpop.permute.xlu1 %2233 }
 0xe64   :  { %v2236_v23 = vunpack.i.h.bf16 %v2234_v22  ;;  %v2235_v24 = vunpack.i.l.bf16 %v2234_v22 }
 0xe66   :  { %v2244_v25 = vpop.permute.xlu0 %2243  ;;  %v1370_v30 = vsel %vm3092_vm15, %v2235_v24, %v2236_v23  ;;  %v1369_v54 = vsel %vm3094_vm2, %v2236_v23, %v1368_v53  ;;  %v1371_v32 = vsel %vm3095_vm3, %v1368_v53, %v2235_v24 }
 0xe67   :  { %v2239_v26 = vpop.permute.xlu1 %2238  ;;  %v2246_v21 = vunpack.i.h.bf16 %v2244_v25  ;;  %v2245_v36 = vunpack.i.l.bf16 %v2244_v25 }
 0xe68   :  { %v2241_v27 = vunpack.i.h.bf16 %v2239_v26  ;;  %v2240_v28 = vunpack.i.l.bf16 %v2239_v26 }
 0xe69   :  { %v1388_v45 = vsel %vm311_vm0, %v2245_v36, %v2246_v21 }
 0xe6a   :  { %v1386_v29 = vpop.permute.xlu0 %1385  ;;  %v1379_v15 = vsel %vm3093_vm1, %v2240_v28, %v2241_v27 }
 0xe6b   :  { %v1377_v31 = vpop.permute.xlu1 %1376  ;;  %v2007_v19 = vpack.c.bf16 %v1379_v15, %v1370_v30  ;;  %v1387_v62 = vsel %vm311_vm0, %v2246_v21, %v1386_v29  ;;  %v1389_v63 = vsel %vm311_vm0, %v1386_v29, %v2245_v36 }
 0xe6c   :  { %v1378_v33 = vsel %vm3096_vm10, %v2241_v27, %v1377_v31  ;;  %v1380_v34 = vsel %vm3097_vm11, %v1377_v31, %v2240_v28  ;;  %v1740_v28 = vld [vmem:[%s3060_s2 + $0x18] sm:$0xff]  ;;  %s2361_s2 = smov 11  }
 0xe6d   :  { %v2009_v20 = vpack.c.bf16 %v1380_v34, %v1371_v32  ;;  %v2024_v35 = vpack.c.bf16 %v1378_v33, %v1369_v54  ;;  %2008 = vmatprep.subr.bf16.mxu0 %v2007_v19 }
 0xe6e   :  { %v2254_v37 = vpop.permute.xlu0 %2253 }
 0xe6f   :  { %v2256_v39 = vunpack.i.h.bf16 %v2254_v37  ;;  %v2255_v40 = vunpack.i.l.bf16 %v2254_v37  ;;  %v2249_v42 = vpop.permute.xlu1 %2248  ;;  %2010 = vmatpush1.bf16.msra.mxu0 %v2009_v20  ;;  %2025 = vmatpush3.bf16.msra.mxu1 %v2024_v35 }
 0xe70   :  { %v2251_v12 = vunpack.i.h.bf16 %v2249_v42  ;;  %v2250_v16 = vunpack.i.l.bf16 %v2249_v42  ;;  %2026 = vmatprep.subr.bf16.mxu1 %v2328_v3 }
 0xe71   :  { %v1405_v61 = vsel %vm330_vm4, %v2255_v40, %v2256_v39 }
 0xe72   :  { %v2259_v17 = vpop.permute.xlu0 %2258  ;;  %v1397_v57 = vsel %vm3091_vm12, %v2250_v16, %v2251_v12  ;;  %v2015_v4 = vpack.c.bf16 %v1405_v61, %v2915_v44 }
 0xe73   :  { %v1395_v58 = vpop.permute.xlu1 %1394  ;;  %v2011_v59 = vpack.c.bf16 %v1397_v57, %v1388_v45  ;;  %v2261_v56 = vunpack.i.h.bf16 %v2259_v17  ;;  %v2260_v8 = vunpack.i.l.bf16 %v2259_v17 }
 0xe74   :  { %v1396_v0 = vsel %vm3098_vm9, %v2251_v12, %v1395_v58  ;;  %v1398_v1 = vsel %vm3099_vm13, %v1395_v58, %v2250_v16 }
 0xe75   :  { %v2013_v49 = vpack.c.bf16 %v1398_v1, %v1389_v63  ;;  %v2027_v2 = vpack.c.bf16 %v1396_v0, %v1387_v62  ;;  %2012 = vmatprep.subr.bf16.mxu0 %v2011_v59  ;;  %v1414_v41 = vsel %vm340_vm6, %v2260_v8, %v2261_v56 }
 0xe76   :  { %v1409_v51 = vpop.permute.xlu0 %1408 }
 0xe77   :  { %v1400_v5 = vpop.permute.xlu1 %1399  ;;  %2014 = vmatpush1.bf16.msra.mxu0 %v2013_v49  ;;  %2028 = vmatpush3.bf16.msra.mxu1 %v2027_v2  ;;  %v1416_v53 = vsel %vm340_vm6, %v2261_v56, %v1409_v51  ;;  %v2360_v49 = vmov 11  }
 0xe78   :  { %v1406_v6 = vsel %vm330_vm4, %v1400_v5, %v2255_v40  ;;  %v1407_v55 = vsel %vm330_vm4, %v2256_v39, %v1400_v5  ;;  %2016 = vmatprep.subr.bf16.mxu0 %v2015_v4  ;;  %2029 = vmatprep.subr.bf16.mxu1 %v2328_v3 }
 0xe79   :  { %v2017_v52 = vpack.c.bf16 %v1406_v6, %v2912_v14  ;;  %v2030_v7 = vpack.c.bf16 %v1407_v55, %v2918_v48  ;;  %v1415_v48 = vsel %vm340_vm6, %v1409_v51, %v2260_v8  ;;  %2268 = vset.pattern.permute.xlu1 %v2360_v49  ;;  %v2327_v51 = vld [vmem:[%s3058_s3] sm:$0xff]  ;;  %v2363_v6 = vmov 12  }
 0xe7a   :  { %v1429_v44 = vpop.permute.xlu0 %1428  ;;  %2269 = vset.pattern.permute.xlu0 %v2363_v6 }
 0xe7b   :  { %v2264_v9 = vpop.permute.xlu1 %2263  ;;  %2018 = vmatpush1.bf16.msra.mxu0 %v2017_v52  ;;  %2031 = vmatpush3.bf16.msra.mxu1 %v2030_v7 }
 0xe7c   :  { %v2266_v10 = vunpack.i.h.bf16 %v2264_v9  ;;  %v2265_v11 = vunpack.i.l.bf16 %v2264_v9  ;;  %2032 = vmatprep.subr.bf16.mxu1 %v2328_v3 }
 0xe7e   :  { %v1423_v43 = vsel %vm350_vm5, %v2265_v11, %v2266_v10  ;;  %v1427_v25 = vpop.permute.xlu0 %1426 }
 0xe7f   :  { %v1418_v50 = vpop.permute.xlu1 %1417  ;;  %v2019_v14 = vpack.c.bf16 %v1423_v43, %v1414_v41  ;;  %v1433_v29 = vsel %vm360_vm7, %v1427_v25, %v1429_v44 }
 0xe80   :  { %v1424_v22 = vsel %vm350_vm5, %v1418_v50, %v2265_v11  ;;  %v1425_v3 = vsel %vm350_vm5, %v2266_v10, %v1418_v50 }
 0xe81   :  { %v2021_v23 = vpack.c.bf16 %v1424_v22, %v1415_v48  ;;  %v2033_v24 = vpack.c.bf16 %v1425_v3, %v1416_v53  ;;  %2020 = vmatprep.subr.bf16.mxu0 %v2019_v14 }
 0xe83   :  { %v1431_v26 = vpop.permute.xlu1 %1430  ;;  %2022 = vmatpush1.bf16.msra.mxu0 %v2021_v23  ;;  %2034 = vmatpush3.bf16.msra.mxu1 %v2033_v24 }
 0xe84   :  { %v1432_v27 = vsel %vm360_vm7, %v1429_v44, %v1431_v26  ;;  %1890 = vmatprep.subr.mxu1 %v2331_v13  ;;  %v1434_v30 = vsel %vm360_vm7, %v1431_v26, %v1427_v25 }
 0xe85   :  { %1460 = vmatprep.subr.mxu0 %v1432_v27 }
 0xe87   :  { %1461 = vmatpush1.msra.mxu0 %v1433_v29  ;;  %1891 = vmatpush3.msra.mxu1 %v1434_v30 }
 0xe88   :  { %1741 = vmatmul.mubr.msk.f32.vlgmr.msra.gmra.mrb[8].mxu0 %vm369_vm8, %v1740_v28  ;;  %1893 = vmatmul.mubr.msk.f32.vlgmr.msra.gmra.mrb[8].mxu1 %vm369_vm8, %v1740_v28 }
 0xe94   :  { %v1439_v15 = vpop.permute.xlu1 %1438 }
 0xf5b   :  { %v1510_v31 = vpop.f32.mrb[8].mxu0  ;;  %v1581_v13 = vpop.f32.mrb[8].mxu1 }
 0xf5c   :  { %v1511_v19 = vadd.f32 %v1510_v31, %v1439_v15  ;;  %v1582_v54 = vadd.f32 %v1581_v13, %v1439_v15  ;;  %v1512_v32 = vpop.f32.mrb[9].mxu0  ;;  %v1894_v33 = vpop.f32.mrb[9].mxu1 }
 0xf5d   :  { %v1513_v34 = vadd.f32 %v1512_v32, %v1439_v15 }
 0xf5e   :  { %v1585_v20 = vmul.f32 %v2488_v46, %v1511_v19  ;;  %v1587_v35 = vmul.f32 %v2482_v38, %v1582_v54 }
 0xf5f   :  { %v1586_v18 = vmul.f32 %v2491_v47, %v1513_v34 }
 0xf60   :  { %v1592_v21 = vmul.f32 %v1585_v20, %v1511_v19  ;;  %v1594_v39 = vmul.f32 %v1587_v35, %v1582_v54 }
 0xf61   :  { %v1593_v36 = vmul.f32 %v1586_v18, %v1513_v34  ;;  %v1588_v37 = vadd.f32 %v1586_v18, %v1585_v20 }
 0xf63   :  { %v1589_v40 = vadd.f32 %v1588_v37, %v1587_v35  ;;  %v1595_v42 = vadd.f32 %v1593_v36, %v1592_v21 }
 0xf65   :  { %1590 = vadd.xlane.f32.xlu0 %v1589_v40  ;;  %v1596_v12 = vadd.f32 %v1595_v42, %v1594_v39 }
 0xf67   :  { %1597 = vadd.xlane.f32.xlu1 %v1596_v12 }
 0xff2   :  { %v1591_v16 = vpop.xlane.xlu0 %1590 }
 0xff3   :  { %v1599_v17 = vrot.slane %v1591_v16, 4 }
 0xff4   :  { %v1598_v45 = vpop.xlane.xlu1 %1597 }
 0xff5   :  { %v1600_v57 = vadd.f32 %v1599_v17, %v1591_v16  ;;  %v1601_v58 = vrot.slane %v1598_v45, 4 }
 0xff7   :  { %v1603_v59 = vmul.f32 0.001953125, %v1600_v57  ;;  %v1602_v61 = vadd.f32 %v1601_v58, %v1598_v45 }
 0xff9   :  { %v1605_v62 = vmul.f32 %v1603_v59, %v1603_v59  ;;  %v1604_v63 = vmul.f32 0.001953125, %v1602_v61 }
 0xffb   :  { %v1606_v0 = vsub.f32 %v1604_v63, %v1605_v62 }
 0xffd   :  { %v1607_v1 = vadd.f32 1e-05, %v1606_v0 }
 0xfff   :  { %2312 = vrsqrt.f32 %v1607_v1 }
0x1009   :  { %v2313_v2 = vpop.eup %2312 }
0x100a   :  { %1610 = vrot.lane.b32.xlu0 %v2313_v2, %s2361_s2 }
0x107c   :  { %v1611_v4 = vpop.permute.xlu0 %1610 }
0x107d   :  { %v1613_v5 = vmul.f32 %v2327_v51, %v1611_v4 }
0x107f   :  { %1615 = vrot.lane.b32.xlu1 %v1613_v5, %s2362_s5 }
0x1083   :  { %1625 = vperm.xlu1 %2268, %v1613_v5  }
0x10f1   :  { %v1616_v55 = vpop.permute.xlu1 %1615 }
0x10f2   :  { %v1618_v52 = vmul.f32 %v1616_v55, %v1603_v59 }
0x10f4   :  { %1620 = vrot.lane.b32.xlu0 %v1618_v52, %s2364_s6 }
0x1102   :  { %v1626_v8 = vpop.permute.xlu1 %1625 }
0x1103   :  { %v1628_v9 = vmul.f32 %v1626_v8, %v1511_v19  ;;  %v1629_v10 = vmul.f32 %v1626_v8, %v1513_v34  ;;  %v1630_v11 = vmul.f32 %v1626_v8, %v1582_v54 }
0x1166   :  { %v1621_v7 = vpop.permute.xlu0 %1620 }
0x1167   :  { %v1623_v56 = vsub.f32 %v2327_v51, %v1621_v7 }
0x1169   :  { %1633 = vperm.xlu0 %2269, %v1623_v56  }
0x11e8   :  { %v1634_v44 = vpop.permute.xlu0 %1633 }
0x11e9   :  { %v3018_v41 = vadd.f32 %v1634_v44, %v1628_v9  ;;  %v3020_v43 = vadd.f32 %v1634_v44, %v1629_v10  ;;  %v3022_v50 = vadd.f32 %v1634_v44, %v1630_v11 }
0x11eb   :  { %v3025_v14 = vmul.f32 0.70710677, %v3018_v41  ;;  %v3028_v48 = vmul.f32 0.70710677, %v3020_v43  ;;  %v3031_v53 = vmul.f32 0.70710677, %v3022_v50 }
0x11ed   :  { %v1651_v22 = vand.u32 2147483647, %v3025_v14  ;;  %v1652_v3 = vand.u32 2147483647, %v3028_v48  ;;  %v1653_v23 = vand.u32 2147483647, %v3031_v53 }
0x11ee   :  { %vm1645_vm0 = vcmp.lt.f32.partialorder %v3025_v14, 0.0  ;;  %vm1646_vm4 = vcmp.lt.f32.partialorder %v3028_v48, 0.0  ;;  %vm1647_vm5 = vcmp.lt.f32.partialorder %v3031_v53, 0.0  ;;  %v1640_v48 = vmul.f32 0.5, %v3020_v43 }
0x11ef   :  { %v1654_v24 = vmul.f32 0.3275911, %v1651_v22  ;;  %v1655_v25 = vmul.f32 0.3275911, %v1652_v3  ;;  %v1656_v26 = vmul.f32 0.3275911, %v1653_v23 }
0x11f0   :  { %v1690_v30 = vsub.f32 0.0, %v1651_v22  ;;  %v1691_v15 = vsub.f32 0.0, %v1652_v3  ;;  %v1692_v31 = vsub.f32 0.0, %v1653_v23  ;;  %v1641_v53 = vmul.f32 0.5, %v3022_v50 }
0x11f1   :  { %v1657_v27 = vadd.f32 1.0, %v1654_v24  ;;  %v1658_v28 = vadd.f32 1.0, %v1655_v25  ;;  %v1659_v29 = vadd.f32 1.0, %v1656_v26  ;;  %v1649_v24 = vsel %vm1646_vm4, -1.0, %v2346_v60 }
0x11f2   :  { %v1693_v19 = vmul.f32 %v1690_v30, %v1651_v22  ;;  %v1694_v33 = vmul.f32 %v1691_v15, %v1652_v3  ;;  %v1695_v35 = vmul.f32 %v1692_v31, %v1653_v23  ;;  %v1648_v3 = vsel %vm1645_vm0, -1.0, %v2346_v60 }
0x11f3   :  { %2314 = vrcp.f32 %v1657_v27  ;;  %v1650_v27 = vsel %vm1647_vm5, -1.0, %v2346_v60 }
0x11f4   :  { %2316 = vrcp.f32 %v1658_v28  ;;  %v1696_v37 = vmul.f32 1.442695, %v1693_v19  ;;  %v1698_v42 = vmul.f32 1.442695, %v1694_v33  ;;  %v1700_v16 = vmul.f32 1.442695, %v1695_v35 }
0x11f5   :  { %2318 = vrcp.f32 %v1659_v29  ;;  %v1639_v28 = vmul.f32 0.5, %v3018_v41 }
0x11f6   :  { %2320 = vpow2.f32 %v1696_v37 }
0x11f7   :  { %2322 = vpow2.f32 %v1698_v42 }
0x11f8   :  { %2324 = vpow2.f32 %v1700_v16 }
0x11fd   :  { %v2315_v13 = vpop.eup %2314 }
0x11fe   :  { %v2317_v54 = vpop.eup %2316  ;;  %v1663_v32 = vmul.f32 1.0614054, %v2315_v13 }
0x11ff   :  { %v2319_v34 = vpop.eup %2318  ;;  %v1664_v20 = vmul.f32 1.0614054, %v2317_v54 }
0x1200   :  { %v1665_v18 = vmul.f32 1.0614054, %v2319_v34  ;;  %v1666_v21 = vadd.f32 -1.4531521, %v1663_v32  ;;  %v2321_v52 = vpop.eup %2320 }
0x1201   :  { %v1667_v36 = vadd.f32 -1.4531521, %v1664_v20  ;;  %v2323_v56 = vpop.eup %2322 }
0x1202   :  { %v1668_v39 = vadd.f32 -1.4531521, %v1665_v18  ;;  %v1669_v40 = vmul.f32 %v2315_v13, %v1666_v21  ;;  %v2325_v10 = vpop.eup %2324 }
0x1203   :  { %v1670_v12 = vmul.f32 %v2317_v54, %v1667_v36 }
0x1204   :  { %v1671_v17 = vmul.f32 %v2319_v34, %v1668_v39  ;;  %v1672_v45 = vadd.f32 1.4214138, %v1669_v40 }
0x1205   :  { %v1673_v57 = vadd.f32 1.4214138, %v1670_v12 }
0x1206   :  { %v1674_v58 = vadd.f32 1.4214138, %v1671_v17  ;;  %v1675_v59 = vmul.f32 %v2315_v13, %v1672_v45 }
0x1207   :  { %v1676_v61 = vmul.f32 %v2317_v54, %v1673_v57 }
0x1208   :  { %v1677_v62 = vmul.f32 %v2319_v34, %v1674_v58  ;;  %v1678_v63 = vadd.f32 -0.28449672, %v1675_v59 }
0x1209   :  { %v1679_v0 = vadd.f32 -0.28449672, %v1676_v61 }
0x120a   :  { %v1680_v1 = vadd.f32 -0.28449672, %v1677_v62  ;;  %v1681_v49 = vmul.f32 %v2315_v13, %v1678_v63 }
0x120b   :  { %v1682_v2 = vmul.f32 %v2317_v54, %v1679_v0 }
0x120c   :  { %v1683_v4 = vmul.f32 %v2319_v34, %v1680_v1  ;;  %v1684_v51 = vadd.f32 0.2548296, %v1681_v49 }
0x120d   :  { %v1685_v5 = vadd.f32 0.2548296, %v1682_v2 }
0x120e   :  { %v1686_v6 = vadd.f32 0.2548296, %v1683_v4  ;;  %v1687_v55 = vmul.f32 %v2315_v13, %v1684_v51 }
0x120f   :  { %v1688_v7 = vmul.f32 %v2317_v54, %v1685_v5 }
0x1210   :  { %v1689_v8 = vmul.f32 %v2319_v34, %v1686_v6  ;;  %v1702_v9 = vmul.f32 %v2321_v52, %v1687_v55 }
0x1211   :  { %v1703_v11 = vmul.f32 %v2323_v56, %v1688_v7 }
0x1212   :  { %v1704_v44 = vmul.f32 %v2325_v10, %v1689_v8  ;;  %v1705_v22 = vsub.f32 1.0, %v1702_v9 }
0x1213   :  { %v1706_v23 = vsub.f32 1.0, %v1703_v11 }
0x1214   :  { %v1707_v25 = vsub.f32 1.0, %v1704_v44  ;;  %v1708_v26 = vmul.f32 %v1705_v22, %v1648_v3 }
0x1215   :  { %v1709_v14 = vmul.f32 %v1706_v23, %v1649_v24 }
0x1216   :  { %v1710_v29 = vmul.f32 %v1707_v25, %v1650_v27  ;;  %v1711_v30 = vadd.f32 1.0, %v1708_v26 }
0x1217   :  { %v1712_v15 = vadd.f32 1.0, %v1709_v14 }
0x1218   :  { %v1713_v31 = vadd.f32 1.0, %v1710_v29  ;;  %v1714_v13 = vmul.f32 %v1711_v30, %v1639_v28 }
0x1219   :  { %v1715_v19 = vmul.f32 %v1712_v15, %v1640_v48 }
0x121a   :  { %v1716_v54 = vmul.f32 %v1713_v31, %v1641_v53  ;;  %v1717_v32 = vmul.f32 %v2488_v46, %v1714_v13 }
0x121b   :  { %v1718_v33 = vmul.f32 %v2491_v47, %v1715_v19 }
0x121c   :  { %v1719_v60 = vmul.f32 %v2482_v38, %v1716_v54  ;;  %1720 = vst [vmem:[%s3061_s4] sm:$0xff] %v1717_v32 }
0x121d   :  { %1721 = vst [vmem:[%s3061_s4 + $0x8] sm:$0xff] %v1718_v33 }
0x121e   :  { %1722 = vst [vmem:[%s3061_s4 + $0x10] sm:$0xff] %v1719_v60 }

</bundles_post_ra>
